<compile_context>
chip_gen: v6e
topology: v6e:2x2x1
jax: 0.10.0
libtpu: 0.0.40
codegen_flags: <defaults>
</compile_context>

<pallas_src>
import functools
import math

import jax
import jax.numpy as jnp
from jax import lax
from jax.experimental import pallas as pl
from jax.experimental.pallas import tpu as pltpu


# ----------------------------- in-kernel helpers -----------------------------

def _layer_norm(x, g, b, eps=1e-6):
    # x: (T, D); g, b: (1, D). eps=1e-6 matches the module (explicit).
    mean = jnp.mean(x, axis=-1, keepdims=True)
    var = jnp.mean((x - mean) ** 2, axis=-1, keepdims=True)
    return (x - mean) * lax.rsqrt(var + eps) * g + b


def _pad_lanes(x, width):
    """Pad last dim with zeros up to `width` so the store is a full-width vst."""
    assert width >= x.shape[-1]
    pad = width - x.shape[-1]
    if pad == 0:
        return x
    zeros = jnp.zeros(x.shape[:-1] + (pad,), x.dtype)
    return jnp.concatenate([x, zeros], axis=-1)


def _mha(q_in, kv_in, wq, bq, wk, bk, wv, bv, wo, bo, nhead):
    """torch.nn.MultiheadAttention semantics (kdim=vdim=d_model, no mask).

    q_in: (Tq, D); kv_in: (Tk, D)
    wq/wk/wv: (D, D) full-width projection slabs of in_proj_weight.T
              (1/sqrt(hd) is pre-folded into wq and bq by the wrapper).
    bq/bk/bv: (1, D);  wo: (D, D) = out_proj.weight.T;  bo: (1, D)
    returns (attn_out (Tq, D), head-averaged attention weights (Tq, Tk)).
    """
    Tq, D = q_in.shape
    Tk = kv_in.shape[0]
    hd = D // nhead

    # Full-width projections: one (T, D) x (D, D) MXU matmul each (K = N = D),
    # instead of H narrow per-head matmuls (~H x better MXU N-utilization).
    q = jnp.dot(q_in, wq, preferred_element_type=jnp.float32) + bq
    k = jnp.dot(kv_in, wk, preferred_element_type=jnp.float32) + bk
    v = jnp.dot(kv_in, wv, preferred_element_type=jnp.float32) + bv

    # Per-head scores/softmax/context. The per-head contraction dim is hd regardless
    # of batching (a leading-head batched dot issues the same H MXU ops), and the
    # streaming loop keeps only ~one (Tq, Tk) f32 score tensor live at a time.
    ctx_heads = []
    p_sum = jnp.zeros((Tq, Tk), jnp.float32)
    for h in range(nhead):
        lo, hi = h * hd, (h + 1) * hd
        q_h = q[:, lo:hi]
        k_h = k[:, lo:hi]
        v_h = v[:, lo:hi]

        s = lax.dot_general(q_h, k_h, (((1,), (1,)), ((), ())),
                            preferred_element_type=jnp.float32)      # (Tq, Tk)
        s = s - jnp.max(s, axis=-1, keepdims=True)
        e = jnp.exp(s)
        # exact reciprocal (approx=True's ~2^-12 rel. error is too big for 1e-4 check)
        p = e * pl.reciprocal(jnp.sum(e, axis=-1, keepdims=True), approx=False)

        p_sum = p_sum + p
        ctx_heads.append(jnp.dot(p, v_h, preferred_element_type=jnp.float32))

    # Head merge along lanes, then a single (Tq, D) x (D, D) out-projection (K = D).
    ctx = jnp.concatenate(ctx_heads, axis=-1)                          # (Tq, D)
    out = jnp.dot(ctx, wo, preferred_element_type=jnp.float32) + bo
    attn = p_sum * (1.0 / nhead)                                       # head average
    return out, attn


# --------------------------------- kernel ------------------------------------

def decoder_layer_kernel(
    # inputs (query tile + resident K/V sources + full weights)
    tgt_q_ref, tgt_kv_ref, mem_ref,
    sa_wq_ref, sa_bq_ref, sa_wk_ref, sa_bk_ref, sa_wv_ref, sa_bv_ref, sa_wo_ref, sa_bo_ref,
    ca_wq_ref, ca_bq_ref, ca_wk_ref, ca_bk_ref, ca_wv_ref, ca_bv_ref, ca_wo_ref, ca_bo_ref,
    ffn_w1_ref, ffn_b1_ref, ffn_w2_ref, ffn_b2_ref,
    ln1_g_ref, ln1_b_ref, ln2_g_ref, ln2_b_ref, ln3_g_ref, ln3_b_ref,
    # outputs
    out_ref, sa_attn_ref, ca_attn_ref,
    *, nhead,
):
    tgt_q = tgt_q_ref[...]    # (tq, D)  query tile (rows are fully independent)
    tgt_kv = tgt_kv_ref[...]  # (Tt, D)  full target for self-attn K/V
    mem = mem_ref[...]        # (Tm, D)  full memory for cross-attn K/V

    # --- self-attention block (post-norm) ---
    sa_out, sa_attn = _mha(
        tgt_q, tgt_kv,
        sa_wq_ref[...], sa_bq_ref[...], sa_wk_ref[...], sa_bk_ref[...],
        sa_wv_ref[...], sa_bv_ref[...], sa_wo_ref[...], sa_bo_ref[...], nhead)
    x = _layer_norm(tgt_q + sa_out, ln1_g_ref[...], ln1_b_ref[...])

    # --- cross-attention block ---
    ca_out, ca_attn = _mha(
        x, mem,
        ca_wq_ref[...], ca_bq_ref[...], ca_wk_ref[...], ca_bk_ref[...],
        ca_wv_ref[...], ca_bv_ref[...], ca_wo_ref[...], ca_bo_ref[...], nhead)
    x = _layer_norm(x + ca_out, ln2_g_ref[...], ln2_b_ref[...])

    # --- positionwise feed-forward (Linear -> ReLU -> Linear) ---
    # TODO(synk): at real ASR sizes use bf16 operands (f32 accumulate) here and for
    #             the score/context matmuls once the 1e-4 tolerance is relaxed.
    h = jnp.dot(x, ffn_w1_ref[...], preferred_element_type=jnp.float32) + ffn_b1_ref[...]
    h = jnp.maximum(h, 0.0)
    f = jnp.dot(h, ffn_w2_ref[...], preferred_element_type=jnp.float32) + ffn_b2_ref[...]
    x = _layer_norm(x + f, ln3_g_ref[...], ln3_b_ref[...])

    out_ref[...] = x
    # Lane-dense stores: attention maps written at 128-multiple lane width
    # (full unmasked vst); the wrapper slices them back to (Tt, Tm).
    sa_attn_ref[...] = _pad_lanes(sa_attn, sa_attn_ref.shape[-1])
    ca_attn_ref[...] = _pad_lanes(ca_attn, ca_attn_ref.shape[-1])


# -------------------------------- wrapper ------------------------------------

def _prep_attention_params(in_w, in_b, nhead):
    """Split in_proj into full-width Q/K/V slabs; fold 1/sqrt(hd) into Q (exact)."""
    D = in_w.shape[0]
    hd = D // nhead
    scale = 1.0 / math.sqrt(hd)
    wq = in_w[:, :D] * scale
    bq = in_b[:, :D] * scale
    wk = in_w[:, D:2 * D]
    bk = in_b[:, D:2 * D]
    wv = in_w[:, 2 * D:]
    bv = in_b[:, 2 * D:]
    return wq, bq, wk, bk, wv, bv


def _pick_vmem_limit():
    """~3/4 of physical VMEM: ~96 MiB on v5e/v6e (128 MiB), ~48 MiB on v7x (64 MiB)."""
    try:
        cap = pltpu.get_tpu_info().vmem_capacity_bytes
    except Exception:
        cap = 64 * 1024 * 1024
    return int(min((cap * 3) // 4, 112 * 1024 * 1024))


def transformer_decoder_layer(tgt, memory, params, nhead,
                              q_block=None, weight_buffer_count=None):
    B, Tt, D = tgt.shape
    _, Tm, _ = memory.shape

    if q_block is None:
        q_block = Tt if Tt <= 128 else 128
    assert Tt % q_block == 0, "Tt must be divisible by the query tile size"
    nqb = Tt // q_block

    sa_wq, sa_bq, sa_wk, sa_bk, sa_wv, sa_bv = _prep_attention_params(
        params["sa_in_w"], params["sa_in_b"], nhead)
    ca_wq, ca_bq, ca_wk, ca_bk, ca_wv, ca_bv = _prep_attention_params(
        params["ca_in_w"], params["ca_in_b"], nhead)

    weights = (
        sa_wq, sa_bq, sa_wk, sa_bk, sa_wv, sa_bv, params["sa_out_w"], params["sa_out_b"],
        ca_wq, ca_bq, ca_wk, ca_bk, ca_wv, ca_bv, params["ca_out_w"], params["ca_out_b"],
        params["ffn_w1"], params["ffn_b1"], params["ffn_w2"], params["ffn_b2"],
        params["ln1_g"], params["ln1_b"],
        params["ln2_g"], params["ln2_b"],
        params["ln3_g"], params["ln3_b"],
    )

    LANE = 128
    Tt_pad = ((Tt + LANE - 1) // LANE) * LANE
    Tm_pad = ((Tm + LANE - 1) // LANE) * LANE

    def weight_spec(arr):
        kwargs = {}
        if weight_buffer_count is not None:
            # Pass weight_buffer_count=1 on v7x at real ASR sizes to single-buffer the
            # constant-index weight blocks and halve their VMEM footprint.
            kwargs["pipeline_mode"] = pl.Buffered(weight_buffer_count)
        return pl.BlockSpec(arr.shape, lambda b, q, _n=arr.ndim: (0,) * _n, **kwargs)

    grid_spec = pltpu.PrefetchScalarGridSpec(
        num_scalar_prefetch=0,
        grid=(B, nqb),
        in_specs=[
            # query tile of tgt (batch dim squeezed)
            pl.BlockSpec((None, q_block, D), lambda b, q: (b, q, 0)),
            # full tgt for self-attn K/V — constant block index across q tiles,
            # so it stays VMEM-resident within a batch element
            pl.BlockSpec((None, Tt, D), lambda b, q: (b, 0, 0)),
            # full memory for cross-attn K/V
            pl.BlockSpec((None, Tm, D), lambda b, q: (b, 0, 0)),
        ] + [weight_spec(w) for w in weights],
        out_specs=[
            pl.BlockSpec((None, q_block, D), lambda b, q: (b, q, 0)),
            pl.BlockSpec((None, q_block, Tt_pad), lambda b, q: (b, q, 0)),
            pl.BlockSpec((None, q_block, Tm_pad), lambda b, q: (b, q, 0)),
        ],
    )

    out_shape = (
        jax.ShapeDtypeStruct((B, Tt, D), jnp.float32),
        jax.ShapeDtypeStruct((B, Tt, Tt_pad), jnp.float32),
        jax.ShapeDtypeStruct((B, Tt, Tm_pad), jnp.float32),
    )

    out, sa_attn_p, ca_attn_p = pl.pallas_call(
        functools.partial(decoder_layer_kernel, nhead=nhead),
        out_shape=out_shape,
        grid_spec=grid_spec,
        compiler_params=pltpu.CompilerParams(
            # batch and query-tile axes are both independent (v7x megacore sharding)
            dimension_semantics=("parallel", "parallel"),
            vmem_limit_bytes=_pick_vmem_limit(),
        ),
    )(tgt, tgt, memory, *weights)

    # Slice the lane-padded attention maps back to their logical widths.
    return out, sa_attn_p[:, :, :Tt], ca_attn_p[:, :, :Tm]


# --------------------------- pure-JAX reference -------------------------------

def reference(tgt, memory, p, nhead):
    def ln(x, g, b):
        m = jnp.mean(x, -1, keepdims=True)
        v = jnp.mean((x - m) ** 2, -1, keepdims=True)
        return (x - m) * lax.rsqrt(v + 1e-6) * g + b

    def mha(q_in, kv_in, in_w, in_b, out_w, out_b):
        B, Tq, D = q_in.shape
        Tk = kv_in.shape[1]
        hd = D // nhead
        q = q_in @ in_w[:, :D] + in_b[0, :D]
        k = kv_in @ in_w[:, D:2 * D] + in_b[0, D:2 * D]
        v = kv_in @ in_w[:, 2 * D:] + in_b[0, 2 * D:]
        q = q.reshape(B, Tq, nhead, hd).transpose(0, 2, 1, 3) * (1.0 / math.sqrt(hd))
        k = k.reshape(B, Tk, nhead, hd).transpose(0, 2, 1, 3)
        v = v.reshape(B, Tk, nhead, hd).transpose(0, 2, 1, 3)
        s = jnp.einsum("bhqd,bhkd->bhqk", q, k)
        pw = jax.nn.softmax(s, axis=-1)
        ctx = jnp.einsum("bhqk,bhkd->bhqd", pw, v)
        ctx = ctx.transpose(0, 2, 1, 3).reshape(B, Tq, D)
        return ctx @ out_w + out_b[0], jnp.mean(pw, axis=1)

    sa, sa_w = mha(tgt, tgt, p["sa_in_w"], p["sa_in_b"], p["sa_out_w"], p["sa_out_b"])
    x = ln(tgt + sa, p["ln1_g"][0], p["ln1_b"][0])
    ca, ca_w = mha(x, memory, p["ca_in_w"], p["ca_in_b"], p["ca_out_w"], p["ca_out_b"])
    x = ln(x + ca, p["ln2_g"][0], p["ln2_b"][0])
    h = jax.nn.relu(x @ p["ffn_w1"] + p["ffn_b1"][0])
    f = h @ p["ffn_w2"] + p["ffn_b2"][0]
    x = ln(x + f, p["ln3_g"][0], p["ln3_b"][0])
    return x, sa_w, ca_w


# ----------------------------------- main -------------------------------------

if __name__ == "__main__":
    B, Tt, Tm = 2, 16, 24
    D, NHEAD, DFF = 32, 4, 64

    key = jax.random.PRNGKey(0)
    ks = jax.random.split(key, 24)

    def init(k, shape, scale=0.1):
        return jax.random.normal(k, shape, jnp.float32) * scale

    params = {
        "sa_in_w": init(ks[0], (D, 3 * D)),
        "sa_in_b": init(ks[1], (1, 3 * D)),
        "sa_out_w": init(ks[2], (D, D)),
        "sa_out_b": init(ks[3], (1, D)),
        "ca_in_w": init(ks[4], (D, 3 * D)),
        "ca_in_b": init(ks[5], (1, 3 * D)),
        "ca_out_w": init(ks[6], (D, D)),
        "ca_out_b": init(ks[7], (1, D)),
        "ffn_w1": init(ks[8], (D, DFF)),
        "ffn_b1": init(ks[9], (1, DFF)),
        "ffn_w2": init(ks[10], (DFF, D)),
        "ffn_b2": init(ks[11], (1, D)),
        "ln1_g": 1.0 + init(ks[12], (1, D), 0.05),
        "ln1_b": init(ks[13], (1, D), 0.05),
        "ln2_g": 1.0 + init(ks[14], (1, D), 0.05),
        "ln2_b": init(ks[15], (1, D), 0.05),
        "ln3_g": 1.0 + init(ks[16], (1, D), 0.05),
        "ln3_b": init(ks[17], (1, D), 0.05),
    }

    tgt = jax.random.normal(ks[18], (B, Tt, D), jnp.float32)
    memory = jax.random.normal(ks[19], (B, Tm, D), jnp.float32)

    # q_block=8 exercises the query-tiling grid axis (2 tiles per batch element).
    out, sa_w, ca_w = transformer_decoder_layer(tgt, memory, params, NHEAD, q_block=8)
    jax.block_until_ready((out, sa_w, ca_w))

    ref_out, ref_sa, ref_ca = reference(tgt, memory, params, NHEAD)
    assert jnp.allclose(out, ref_out, rtol=1e-4, atol=1e-4)
    assert jnp.allclose(sa_w, ref_sa, rtol=1e-4, atol=1e-4)
    assert jnp.allclose(ca_w, ref_ca, rtol=1e-4, atol=1e-4)

    print("KERNEL_OK")
</pallas_src>

<mosaic_0001>
module attributes {stable_mosaic.version = 11 : i64} {
  func.func @decoder_layer_kernel(%arg0: i32, %arg1: i32, %arg2: memref<1x8x32xf32, #tpu.memory_space<vmem>>, %arg3: memref<1x16x32xf32, #tpu.memory_space<vmem>>, %arg4: memref<1x24x32xf32, #tpu.memory_space<vmem>>, %arg5: memref<32x32xf32, #tpu.memory_space<vmem>>, %arg6: memref<1x32xf32, #tpu.memory_space<vmem>>, %arg7: memref<32x32xf32, #tpu.memory_space<vmem>>, %arg8: memref<1x32xf32, #tpu.memory_space<vmem>>, %arg9: memref<32x32xf32, #tpu.memory_space<vmem>>, %arg10: memref<1x32xf32, #tpu.memory_space<vmem>>, %arg11: memref<32x32xf32, #tpu.memory_space<vmem>>, %arg12: memref<1x32xf32, #tpu.memory_space<vmem>>, %arg13: memref<32x32xf32, #tpu.memory_space<vmem>>, %arg14: memref<1x32xf32, #tpu.memory_space<vmem>>, %arg15: memref<32x32xf32, #tpu.memory_space<vmem>>, %arg16: memref<1x32xf32, #tpu.memory_space<vmem>>, %arg17: memref<32x32xf32, #tpu.memory_space<vmem>>, %arg18: memref<1x32xf32, #tpu.memory_space<vmem>>, %arg19: memref<32x32xf32, #tpu.memory_space<vmem>>, %arg20: memref<1x32xf32, #tpu.memory_space<vmem>>, %arg21: memref<32x64xf32, #tpu.memory_space<vmem>>, %arg22: memref<1x64xf32, #tpu.memory_space<vmem>>, %arg23: memref<64x32xf32, #tpu.memory_space<vmem>>, %arg24: memref<1x32xf32, #tpu.memory_space<vmem>>, %arg25: memref<1x32xf32, #tpu.memory_space<vmem>>, %arg26: memref<1x32xf32, #tpu.memory_space<vmem>>, %arg27: memref<1x32xf32, #tpu.memory_space<vmem>>, %arg28: memref<1x32xf32, #tpu.memory_space<vmem>>, %arg29: memref<1x32xf32, #tpu.memory_space<vmem>>, %arg30: memref<1x32xf32, #tpu.memory_space<vmem>>, %arg31: memref<1x8x32xf32, #tpu.memory_space<vmem>>, %arg32: memref<1x8x128xf32, #tpu.memory_space<vmem>>, %arg33: memref<1x8x128xf32, #tpu.memory_space<vmem>>) attributes {dimension_semantics = [#tpu.dimension_semantics<parallel>, #tpu.dimension_semantics<parallel>], iteration_bounds = array<i64: 2, 2>, scalar_prefetch = 0 : i64, scratch_operands = 0 : i64, tpu.core_type = #tpu.core_type<tc>, window_params = [{transform_indices = @transform_0, window_bounds = array<i64: 1, 8, 32>}, {transform_indices = @transform_1, window_bounds = array<i64: 1, 16, 32>}, {transform_indices = @transform_2, window_bounds = array<i64: 1, 24, 32>}, {pipeline_mode = #tpu.pipeline_mode<synchronous>, transform_indices = @transform_3, window_bounds = array<i64: 32, 32>}, {pipeline_mode = #tpu.pipeline_mode<synchronous>, transform_indices = @transform_4, window_bounds = array<i64: 1, 32>}, {pipeline_mode = #tpu.pipeline_mode<synchronous>, transform_indices = @transform_5, window_bounds = array<i64: 32, 32>}, {pipeline_mode = #tpu.pipeline_mode<synchronous>, transform_indices = @transform_6, window_bounds = array<i64: 1, 32>}, {pipeline_mode = #tpu.pipeline_mode<synchronous>, transform_indices = @transform_7, window_bounds = array<i64: 32, 32>}, {pipeline_mode = #tpu.pipeline_mode<synchronous>, transform_indices = @transform_8, window_bounds = array<i64: 1, 32>}, {pipeline_mode = #tpu.pipeline_mode<synchronous>, transform_indices = @transform_9, window_bounds = array<i64: 32, 32>}, {pipeline_mode = #tpu.pipeline_mode<synchronous>, transform_indices = @transform_10, window_bounds = array<i64: 1, 32>}, {pipeline_mode = #tpu.pipeline_mode<synchronous>, transform_indices = @transform_11, window_bounds = array<i64: 32, 32>}, {pipeline_mode = #tpu.pipeline_mode<synchronous>, transform_indices = @transform_12, window_bounds = array<i64: 1, 32>}, {pipeline_mode = #tpu.pipeline_mode<synchronous>, transform_indices = @transform_13, window_bounds = array<i64: 32, 32>}, {pipeline_mode = #tpu.pipeline_mode<synchronous>, transform_indices = @transform_14, window_bounds = array<i64: 1, 32>}, {pipeline_mode = #tpu.pipeline_mode<synchronous>, transform_indices = @transform_15, window_bounds = array<i64: 32, 32>}, {pipeline_mode = #tpu.pipeline_mode<synchronous>, transform_indices = @transform_16, window_bounds = array<i64: 1, 32>}, {pipeline_mode = #tpu.pipeline_mode<synchronous>, transform_indices = @transform_17, window_bounds = array<i64: 32, 32>}, {pipeline_mode = #tpu.pipeline_mode<synchronous>, transform_indices = @transform_18, window_bounds = array<i64: 1, 32>}, {pipeline_mode = #tpu.pipeline_mode<synchronous>, transform_indices = @transform_19, window_bounds = array<i64: 32, 64>}, {pipeline_mode = #tpu.pipeline_mode<synchronous>, transform_indices = @transform_20, window_bounds = array<i64: 1, 64>}, {pipeline_mode = #tpu.pipeline_mode<synchronous>, transform_indices = @transform_21, window_bounds = array<i64: 64, 32>}, {pipeline_mode = #tpu.pipeline_mode<synchronous>, transform_indices = @transform_22, window_bounds = array<i64: 1, 32>}, {pipeline_mode = #tpu.pipeline_mode<synchronous>, transform_indices = @transform_23, window_bounds = array<i64: 1, 32>}, {pipeline_mode = #tpu.pipeline_mode<synchronous>, transform_indices = @transform_24, window_bounds = array<i64: 1, 32>}, {pipeline_mode = #tpu.pipeline_mode<synchronous>, transform_indices = @transform_25, window_bounds = array<i64: 1, 32>}, {pipeline_mode = #tpu.pipeline_mode<synchronous>, transform_indices = @transform_26, window_bounds = array<i64: 1, 32>}, {pipeline_mode = #tpu.pipeline_mode<synchronous>, transform_indices = @transform_27, window_bounds = array<i64: 1, 32>}, {pipeline_mode = #tpu.pipeline_mode<synchronous>, transform_indices = @transform_28, window_bounds = array<i64: 1, 32>}, {transform_indices = @transform_29, window_bounds = array<i64: 1, 8, 32>}, {transform_indices = @transform_30, window_bounds = array<i64: 1, 8, 128>}, {transform_indices = @transform_31, window_bounds = array<i64: 1, 8, 128>}]} {
    %c0 = arith.constant 0 : index
    %c0_0 = arith.constant 0 : index
    %c0_1 = arith.constant 0 : index
    %0 = vector.load %arg2[%c0, %c0_0, %c0_1] : memref<1x8x32xf32, #tpu.memory_space<vmem>>, vector<1x8x32xf32>
    %1 = vector.shape_cast %0 : vector<1x8x32xf32> to vector<8x32xf32>
    %c0_2 = arith.constant 0 : index
    %c0_3 = arith.constant 0 : index
    %c0_4 = arith.constant 0 : index
    %2 = vector.load %arg3[%c0_2, %c0_3, %c0_4] : memref<1x16x32xf32, #tpu.memory_space<vmem>>, vector<1x16x32xf32>
    %3 = vector.shape_cast %2 : vector<1x16x32xf32> to vector<16x32xf32>
    %c0_5 = arith.constant 0 : index
    %c0_6 = arith.constant 0 : index
    %c0_7 = arith.constant 0 : index
    %4 = vector.load %arg4[%c0_5, %c0_6, %c0_7] : memref<1x24x32xf32, #tpu.memory_space<vmem>>, vector<1x24x32xf32>
    %5 = vector.shape_cast %4 : vector<1x24x32xf32> to vector<24x32xf32>
    %c0_8 = arith.constant 0 : index
    %c0_9 = arith.constant 0 : index
    %6 = vector.load %arg5[%c0_8, %c0_9] : memref<32x32xf32, #tpu.memory_space<vmem>>, vector<32x32xf32>
    %c0_10 = arith.constant 0 : index
    %c0_11 = arith.constant 0 : index
    %7 = vector.load %arg6[%c0_10, %c0_11] : memref<1x32xf32, #tpu.memory_space<vmem>>, vector<1x32xf32>
    %c0_12 = arith.constant 0 : index
    %c0_13 = arith.constant 0 : index
    %8 = vector.load %arg7[%c0_12, %c0_13] : memref<32x32xf32, #tpu.memory_space<vmem>>, vector<32x32xf32>
    %c0_14 = arith.constant 0 : index
    %c0_15 = arith.constant 0 : index
    %9 = vector.load %arg8[%c0_14, %c0_15] : memref<1x32xf32, #tpu.memory_space<vmem>>, vector<1x32xf32>
    %c0_16 = arith.constant 0 : index
    %c0_17 = arith.constant 0 : index
    %10 = vector.load %arg9[%c0_16, %c0_17] : memref<32x32xf32, #tpu.memory_space<vmem>>, vector<32x32xf32>
    %c0_18 = arith.constant 0 : index
    %c0_19 = arith.constant 0 : index
    %11 = vector.load %arg10[%c0_18, %c0_19] : memref<1x32xf32, #tpu.memory_space<vmem>>, vector<1x32xf32>
    %c0_20 = arith.constant 0 : index
    %c0_21 = arith.constant 0 : index
    %12 = vector.load %arg11[%c0_20, %c0_21] : memref<32x32xf32, #tpu.memory_space<vmem>>, vector<32x32xf32>
    %c0_22 = arith.constant 0 : index
    %c0_23 = arith.constant 0 : index
    %13 = vector.load %arg12[%c0_22, %c0_23] : memref<1x32xf32, #tpu.memory_space<vmem>>, vector<1x32xf32>
    %cst = arith.constant dense<0.000000e+00> : vector<8x32xf32>
    %14 = tpu.matmul %1, %6, %cst {dimension_numbers = #tpu.dot_dimension_numbers<[1], [0], [0], [1], [0, 0, 1, 1], [], []>} : vector<8x32xf32>, vector<32x32xf32>, vector<8x32xf32> -> vector<8x32xf32>
    %15 = vector.broadcast %7 : vector<1x32xf32> to vector<8x32xf32>
    %16 = arith.addf %14, %15 : vector<8x32xf32>
    %cst_24 = arith.constant dense<0.000000e+00> : vector<16x32xf32>
    %17 = tpu.matmul %3, %8, %cst_24 {dimension_numbers = #tpu.dot_dimension_numbers<[1], [0], [0], [1], [0, 0, 1, 1], [], []>} : vector<16x32xf32>, vector<32x32xf32>, vector<16x32xf32> -> vector<16x32xf32>
    %18 = vector.broadcast %9 : vector<1x32xf32> to vector<16x32xf32>
    %19 = arith.addf %17, %18 : vector<16x32xf32>
    %cst_25 = arith.constant dense<0.000000e+00> : vector<16x32xf32>
    %20 = tpu.matmul %3, %10, %cst_25 {dimension_numbers = #tpu.dot_dimension_numbers<[1], [0], [0], [1], [0, 0, 1, 1], [], []>} : vector<16x32xf32>, vector<32x32xf32>, vector<16x32xf32> -> vector<16x32xf32>
    %21 = vector.broadcast %11 : vector<1x32xf32> to vector<16x32xf32>
    %22 = arith.addf %20, %21 : vector<16x32xf32>
    %cst_26 = arith.constant 0.000000e+00 : f32
    %23 = vector.broadcast %cst_26 : f32 to vector<8x16xf32>
    %24 = vector.extract_strided_slice %16 {offsets = [0, 0], sizes = [8, 8], strides = [1, 1]} : vector<8x32xf32> to vector<8x8xf32>
    %25 = vector.extract_strided_slice %19 {offsets = [0, 0], sizes = [16, 8], strides = [1, 1]} : vector<16x32xf32> to vector<16x8xf32>
    %26 = vector.extract_strided_slice %22 {offsets = [0, 0], sizes = [16, 8], strides = [1, 1]} : vector<16x32xf32> to vector<16x8xf32>
    %cst_27 = arith.constant dense<0.000000e+00> : vector<8x16xf32>
    %27 = tpu.matmul %24, %25, %cst_27 {dimension_numbers = #tpu.dot_dimension_numbers<[1], [1], [0], [0], [0, 0, 1, 0], [], []>} : vector<8x8xf32>, vector<16x8xf32>, vector<8x16xf32> -> vector<8x16xf32>
    %cst_28 = arith.constant dense<0xFF800000> : vector<8xf32>
    %28 = vector.multi_reduction <maximumf>, %27, %cst_28 [1] : vector<8x16xf32> to vector<8xf32>
    %29 = vector.shape_cast %28 : vector<8xf32> to vector<8x1xf32>
    %30 = vector.broadcast %29 : vector<8x1xf32> to vector<8x16xf32>
    %31 = arith.subf %27, %30 : vector<8x16xf32>
    %32 = math.exp %31 : vector<8x16xf32>
    %cst_29 = arith.constant dense<0.000000e+00> : vector<8xf32>
    %33 = vector.multi_reduction <add>, %32, %cst_29 [1] : vector<8x16xf32> to vector<8xf32>
    %34 = vector.shape_cast %33 : vector<8xf32> to vector<8x1xf32>
    %35 = tpu.reciprocal %34 : vector<8x1xf32> -> vector<8x1xf32>
    %36 = vector.broadcast %35 : vector<8x1xf32> to vector<8x16xf32>
    %37 = arith.mulf %32, %36 : vector<8x16xf32>
    %38 = arith.addf %23, %37 : vector<8x16xf32>
    %cst_30 = arith.constant dense<0.000000e+00> : vector<8x8xf32>
    %39 = tpu.matmul %37, %26, %cst_30 {dimension_numbers = #tpu.dot_dimension_numbers<[1], [0], [0], [1], [0, 0, 1, 1], [], []>} : vector<8x16xf32>, vector<16x8xf32>, vector<8x8xf32> -> vector<8x8xf32>
    %40 = vector.extract_strided_slice %16 {offsets = [0, 8], sizes = [8, 8], strides = [1, 1]} : vector<8x32xf32> to vector<8x8xf32>
    %41 = vector.extract_strided_slice %19 {offsets = [0, 8], sizes = [16, 8], strides = [1, 1]} : vector<16x32xf32> to vector<16x8xf32>
    %42 = vector.extract_strided_slice %22 {offsets = [0, 8], sizes = [16, 8], strides = [1, 1]} : vector<16x32xf32> to vector<16x8xf32>
    %cst_31 = arith.constant dense<0.000000e+00> : vector<8x16xf32>
    %43 = tpu.matmul %40, %41, %cst_31 {dimension_numbers = #tpu.dot_dimension_numbers<[1], [1], [0], [0], [0, 0, 1, 0], [], []>} : vector<8x8xf32>, vector<16x8xf32>, vector<8x16xf32> -> vector<8x16xf32>
    %cst_32 = arith.constant dense<0xFF800000> : vector<8xf32>
    %44 = vector.multi_reduction <maximumf>, %43, %cst_32 [1] : vector<8x16xf32> to vector<8xf32>
    %45 = vector.shape_cast %44 : vector<8xf32> to vector<8x1xf32>
    %46 = vector.broadcast %45 : vector<8x1xf32> to vector<8x16xf32>
    %47 = arith.subf %43, %46 : vector<8x16xf32>
    %48 = math.exp %47 : vector<8x16xf32>
    %cst_33 = arith.constant dense<0.000000e+00> : vector<8xf32>
    %49 = vector.multi_reduction <add>, %48, %cst_33 [1] : vector<8x16xf32> to vector<8xf32>
    %50 = vector.shape_cast %49 : vector<8xf32> to vector<8x1xf32>
    %51 = tpu.reciprocal %50 : vector<8x1xf32> -> vector<8x1xf32>
    %52 = vector.broadcast %51 : vector<8x1xf32> to vector<8x16xf32>
    %53 = arith.mulf %48, %52 : vector<8x16xf32>
    %54 = arith.addf %38, %53 : vector<8x16xf32>
    %cst_34 = arith.constant dense<0.000000e+00> : vector<8x8xf32>
    %55 = tpu.matmul %53, %42, %cst_34 {dimension_numbers = #tpu.dot_dimension_numbers<[1], [0], [0], [1], [0, 0, 1, 1], [], []>} : vector<8x16xf32>, vector<16x8xf32>, vector<8x8xf32> -> vector<8x8xf32>
    %56 = vector.extract_strided_slice %16 {offsets = [0, 16], sizes = [8, 8], strides = [1, 1]} : vector<8x32xf32> to vector<8x8xf32>
    %57 = vector.extract_strided_slice %19 {offsets = [0, 16], sizes = [16, 8], strides = [1, 1]} : vector<16x32xf32> to vector<16x8xf32>
    %58 = vector.extract_strided_slice %22 {offsets = [0, 16], sizes = [16, 8], strides = [1, 1]} : vector<16x32xf32> to vector<16x8xf32>
    %cst_35 = arith.constant dense<0.000000e+00> : vector<8x16xf32>
    %59 = tpu.matmul %56, %57, %cst_35 {dimension_numbers = #tpu.dot_dimension_numbers<[1], [1], [0], [0], [0, 0, 1, 0], [], []>} : vector<8x8xf32>, vector<16x8xf32>, vector<8x16xf32> -> vector<8x16xf32>
    %cst_36 = arith.constant dense<0xFF800000> : vector<8xf32>
    %60 = vector.multi_reduction <maximumf>, %59, %cst_36 [1] : vector<8x16xf32> to vector<8xf32>
    %61 = vector.shape_cast %60 : vector<8xf32> to vector<8x1xf32>
    %62 = vector.broadcast %61 : vector<8x1xf32> to vector<8x16xf32>
    %63 = arith.subf %59, %62 : vector<8x16xf32>
    %64 = math.exp %63 : vector<8x16xf32>
    %cst_37 = arith.constant dense<0.000000e+00> : vector<8xf32>
    %65 = vector.multi_reduction <add>, %64, %cst_37 [1] : vector<8x16xf32> to vector<8xf32>
    %66 = vector.shape_cast %65 : vector<8xf32> to vector<8x1xf32>
    %67 = tpu.reciprocal %66 : vector<8x1xf32> -> vector<8x1xf32>
    %68 = vector.broadcast %67 : vector<8x1xf32> to vector<8x16xf32>
    %69 = arith.mulf %64, %68 : vector<8x16xf32>
    %70 = arith.addf %54, %69 : vector<8x16xf32>
    %cst_38 = arith.constant dense<0.000000e+00> : vector<8x8xf32>
    %71 = tpu.matmul %69, %58, %cst_38 {dimension_numbers = #tpu.dot_dimension_numbers<[1], [0], [0], [1], [0, 0, 1, 1], [], []>} : vector<8x16xf32>, vector<16x8xf32>, vector<8x8xf32> -> vector<8x8xf32>
    %72 = vector.extract_strided_slice %16 {offsets = [0, 24], sizes = [8, 8], strides = [1, 1]} : vector<8x32xf32> to vector<8x8xf32>
    %73 = vector.extract_strided_slice %19 {offsets = [0, 24], sizes = [16, 8], strides = [1, 1]} : vector<16x32xf32> to vector<16x8xf32>
    %74 = vector.extract_strided_slice %22 {offsets = [0, 24], sizes = [16, 8], strides = [1, 1]} : vector<16x32xf32> to vector<16x8xf32>
    %cst_39 = arith.constant dense<0.000000e+00> : vector<8x16xf32>
    %75 = tpu.matmul %72, %73, %cst_39 {dimension_numbers = #tpu.dot_dimension_numbers<[1], [1], [0], [0], [0, 0, 1, 0], [], []>} : vector<8x8xf32>, vector<16x8xf32>, vector<8x16xf32> -> vector<8x16xf32>
    %cst_40 = arith.constant dense<0xFF800000> : vector<8xf32>
    %76 = vector.multi_reduction <maximumf>, %75, %cst_40 [1] : vector<8x16xf32> to vector<8xf32>
    %77 = vector.shape_cast %76 : vector<8xf32> to vector<8x1xf32>
    %78 = vector.broadcast %77 : vector<8x1xf32> to vector<8x16xf32>
    %79 = arith.subf %75, %78 : vector<8x16xf32>
    %80 = math.exp %79 : vector<8x16xf32>
    %cst_41 = arith.constant dense<0.000000e+00> : vector<8xf32>
    %81 = vector.multi_reduction <add>, %80, %cst_41 [1] : vector<8x16xf32> to vector<8xf32>
    %82 = vector.shape_cast %81 : vector<8xf32> to vector<8x1xf32>
    %83 = tpu.reciprocal %82 : vector<8x1xf32> -> vector<8x1xf32>
    %84 = vector.broadcast %83 : vector<8x1xf32> to vector<8x16xf32>
    %85 = arith.mulf %80, %84 : vector<8x16xf32>
    %86 = arith.addf %70, %85 : vector<8x16xf32>
    %cst_42 = arith.constant dense<0.000000e+00> : vector<8x8xf32>
    %87 = tpu.matmul %85, %74, %cst_42 {dimension_numbers = #tpu.dot_dimension_numbers<[1], [0], [0], [1], [0, 0, 1, 1], [], []>} : vector<8x16xf32>, vector<16x8xf32>, vector<8x8xf32> -> vector<8x8xf32>
    %88 = tpu.concatenate %39, %55, %71, %87 in 1 : vector<8x8xf32>, vector<8x8xf32>, vector<8x8xf32>, vector<8x8xf32> -> vector<8x32xf32>
    %cst_43 = arith.constant dense<0.000000e+00> : vector<8x32xf32>
    %89 = tpu.matmul %88, %12, %cst_43 {dimension_numbers = #tpu.dot_dimension_numbers<[1], [0], [0], [1], [0, 0, 1, 1], [], []>} : vector<8x32xf32>, vector<32x32xf32>, vector<8x32xf32> -> vector<8x32xf32>
    %90 = vector.broadcast %13 : vector<1x32xf32> to vector<8x32xf32>
    %91 = arith.addf %89, %90 : vector<8x32xf32>
    %cst_44 = arith.constant 2.500000e-01 : f32
    %92 = vector.broadcast %cst_44 : f32 to vector<8x16xf32>
    %93 = arith.mulf %86, %92 : vector<8x16xf32>
    %94 = arith.addf %1, %91 : vector<8x32xf32>
    %c0_45 = arith.constant 0 : index
    %c0_46 = arith.constant 0 : index
    %95 = vector.load %arg25[%c0_45, %c0_46] : memref<1x32xf32, #tpu.memory_space<vmem>>, vector<1x32xf32>
    %c0_47 = arith.constant 0 : index
    %c0_48 = arith.constant 0 : index
    %96 = vector.load %arg26[%c0_47, %c0_48] : memref<1x32xf32, #tpu.memory_space<vmem>>, vector<1x32xf32>
    %cst_49 = arith.constant dense<0.000000e+00> : vector<8xf32>
    %97 = vector.multi_reduction <add>, %94, %cst_49 [1] : vector<8x32xf32> to vector<8xf32>
    %98 = vector.shape_cast %97 : vector<8xf32> to vector<8x1xf32>
    %cst_50 = arith.constant 3.200000e+01 : f32
    %99 = vector.broadcast %cst_50 : f32 to vector<8x1xf32>
    %100 = arith.divf %98, %99 : vector<8x1xf32>
    %101 = vector.broadcast %100 : vector<8x1xf32> to vector<8x32xf32>
    %102 = arith.subf %94, %101 : vector<8x32xf32>
    %103 = arith.mulf %102, %102 : vector<8x32xf32>
    %cst_51 = arith.constant dense<0.000000e+00> : vector<8xf32>
    %104 = vector.multi_reduction <add>, %103, %cst_51 [1] : vector<8x32xf32> to vector<8xf32>
    %105 = vector.shape_cast %104 : vector<8xf32> to vector<8x1xf32>
    %cst_52 = arith.constant 3.200000e+01 : f32
    %106 = vector.broadcast %cst_52 : f32 to vector<8x1xf32>
    %107 = arith.divf %105, %106 : vector<8x1xf32>
    %108 = vector.broadcast %100 : vector<8x1xf32> to vector<8x32xf32>
    %109 = arith.subf %94, %108 : vector<8x32xf32>
    %cst_53 = arith.constant 9.99999997E-7 : f32
    %110 = vector.broadcast %cst_53 : f32 to vector<8x1xf32>
    %111 = arith.addf %107, %110 : vector<8x1xf32>
    %112 = math.rsqrt %111 : vector<8x1xf32>
    %113 = vector.broadcast %112 : vector<8x1xf32> to vector<8x32xf32>
    %114 = arith.mulf %109, %113 : vector<8x32xf32>
    %115 = vector.broadcast %95 : vector<1x32xf32> to vector<8x32xf32>
    %116 = arith.mulf %114, %115 : vector<8x32xf32>
    %117 = vector.broadcast %96 : vector<1x32xf32> to vector<8x32xf32>
    %118 = arith.addf %116, %117 : vector<8x32xf32>
    %c0_54 = arith.constant 0 : index
    %c0_55 = arith.constant 0 : index
    %119 = vector.load %arg13[%c0_54, %c0_55] : memref<32x32xf32, #tpu.memory_space<vmem>>, vector<32x32xf32>
    %c0_56 = arith.constant 0 : index
    %c0_57 = arith.constant 0 : index
    %120 = vector.load %arg14[%c0_56, %c0_57] : memref<1x32xf32, #tpu.memory_space<vmem>>, vector<1x32xf32>
    %c0_58 = arith.constant 0 : index
    %c0_59 = arith.constant 0 : index
    %121 = vector.load %arg15[%c0_58, %c0_59] : memref<32x32xf32, #tpu.memory_space<vmem>>, vector<32x32xf32>
    %c0_60 = arith.constant 0 : index
    %c0_61 = arith.constant 0 : index
    %122 = vector.load %arg16[%c0_60, %c0_61] : memref<1x32xf32, #tpu.memory_space<vmem>>, vector<1x32xf32>
    %c0_62 = arith.constant 0 : index
    %c0_63 = arith.constant 0 : index
    %123 = vector.load %arg17[%c0_62, %c0_63] : memref<32x32xf32, #tpu.memory_space<vmem>>, vector<32x32xf32>
    %c0_64 = arith.constant 0 : index
    %c0_65 = arith.constant 0 : index
    %124 = vector.load %arg18[%c0_64, %c0_65] : memref<1x32xf32, #tpu.memory_space<vmem>>, vector<1x32xf32>
    %c0_66 = arith.constant 0 : index
    %c0_67 = arith.constant 0 : index
    %125 = vector.load %arg19[%c0_66, %c0_67] : memref<32x32xf32, #tpu.memory_space<vmem>>, vector<32x32xf32>
    %c0_68 = arith.constant 0 : index
    %c0_69 = arith.constant 0 : index
    %126 = vector.load %arg20[%c0_68, %c0_69] : memref<1x32xf32, #tpu.memory_space<vmem>>, vector<1x32xf32>
    %cst_70 = arith.constant dense<0.000000e+00> : vector<8x32xf32>
    %127 = tpu.matmul %118, %119, %cst_70 {dimension_numbers = #tpu.dot_dimension_numbers<[1], [0], [0], [1], [0, 0, 1, 1], [], []>} : vector<8x32xf32>, vector<32x32xf32>, vector<8x32xf32> -> vector<8x32xf32>
    %128 = vector.broadcast %120 : vector<1x32xf32> to vector<8x32xf32>
    %129 = arith.addf %127, %128 : vector<8x32xf32>
    %cst_71 = arith.constant dense<0.000000e+00> : vector<24x32xf32>
    %130 = tpu.matmul %5, %121, %cst_71 {dimension_numbers = #tpu.dot_dimension_numbers<[1], [0], [0], [1], [0, 0, 1, 1], [], []>} : vector<24x32xf32>, vector<32x32xf32>, vector<24x32xf32> -> vector<24x32xf32>
    %131 = vector.broadcast %122 : vector<1x32xf32> to vector<24x32xf32>
    %132 = arith.addf %130, %131 : vector<24x32xf32>
    %cst_72 = arith.constant dense<0.000000e+00> : vector<24x32xf32>
    %133 = tpu.matmul %5, %123, %cst_72 {dimension_numbers = #tpu.dot_dimension_numbers<[1], [0], [0], [1], [0, 0, 1, 1], [], []>} : vector<24x32xf32>, vector<32x32xf32>, vector<24x32xf32> -> vector<24x32xf32>
    %134 = vector.broadcast %124 : vector<1x32xf32> to vector<24x32xf32>
    %135 = arith.addf %133, %134 : vector<24x32xf32>
    %cst_73 = arith.constant 0.000000e+00 : f32
    %136 = vector.broadcast %cst_73 : f32 to vector<8x24xf32>
    %137 = vector.extract_strided_slice %129 {offsets = [0, 0], sizes = [8, 8], strides = [1, 1]} : vector<8x32xf32> to vector<8x8xf32>
    %138 = vector.extract_strided_slice %132 {offsets = [0, 0], sizes = [24, 8], strides = [1, 1]} : vector<24x32xf32> to vector<24x8xf32>
    %139 = vector.extract_strided_slice %135 {offsets = [0, 0], sizes = [24, 8], strides = [1, 1]} : vector<24x32xf32> to vector<24x8xf32>
    %cst_74 = arith.constant dense<0.000000e+00> : vector<8x24xf32>
    %140 = tpu.matmul %137, %138, %cst_74 {dimension_numbers = #tpu.dot_dimension_numbers<[1], [1], [0], [0], [0, 0, 1, 0], [], []>} : vector<8x8xf32>, vector<24x8xf32>, vector<8x24xf32> -> vector<8x24xf32>
    %cst_75 = arith.constant dense<0xFF800000> : vector<8xf32>
    %141 = vector.multi_reduction <maximumf>, %140, %cst_75 [1] : vector<8x24xf32> to vector<8xf32>
    %142 = vector.shape_cast %141 : vector<8xf32> to vector<8x1xf32>
    %143 = vector.broadcast %142 : vector<8x1xf32> to vector<8x24xf32>
    %144 = arith.subf %140, %143 : vector<8x24xf32>
    %145 = math.exp %144 : vector<8x24xf32>
    %cst_76 = arith.constant dense<0.000000e+00> : vector<8xf32>
    %146 = vector.multi_reduction <add>, %145, %cst_76 [1] : vector<8x24xf32> to vector<8xf32>
    %147 = vector.shape_cast %146 : vector<8xf32> to vector<8x1xf32>
    %148 = tpu.reciprocal %147 : vector<8x1xf32> -> vector<8x1xf32>
    %149 = vector.broadcast %148 : vector<8x1xf32> to vector<8x24xf32>
    %150 = arith.mulf %145, %149 : vector<8x24xf32>
    %151 = arith.addf %136, %150 : vector<8x24xf32>
    %cst_77 = arith.constant dense<0.000000e+00> : vector<8x8xf32>
    %152 = tpu.matmul %150, %139, %cst_77 {dimension_numbers = #tpu.dot_dimension_numbers<[1], [0], [0], [1], [0, 0, 1, 1], [], []>} : vector<8x24xf32>, vector<24x8xf32>, vector<8x8xf32> -> vector<8x8xf32>
    %153 = vector.extract_strided_slice %129 {offsets = [0, 8], sizes = [8, 8], strides = [1, 1]} : vector<8x32xf32> to vector<8x8xf32>
    %154 = vector.extract_strided_slice %132 {offsets = [0, 8], sizes = [24, 8], strides = [1, 1]} : vector<24x32xf32> to vector<24x8xf32>
    %155 = vector.extract_strided_slice %135 {offsets = [0, 8], sizes = [24, 8], strides = [1, 1]} : vector<24x32xf32> to vector<24x8xf32>
    %cst_78 = arith.constant dense<0.000000e+00> : vector<8x24xf32>
    %156 = tpu.matmul %153, %154, %cst_78 {dimension_numbers = #tpu.dot_dimension_numbers<[1], [1], [0], [0], [0, 0, 1, 0], [], []>} : vector<8x8xf32>, vector<24x8xf32>, vector<8x24xf32> -> vector<8x24xf32>
    %cst_79 = arith.constant dense<0xFF800000> : vector<8xf32>
    %157 = vector.multi_reduction <maximumf>, %156, %cst_79 [1] : vector<8x24xf32> to vector<8xf32>
    %158 = vector.shape_cast %157 : vector<8xf32> to vector<8x1xf32>
    %159 = vector.broadcast %158 : vector<8x1xf32> to vector<8x24xf32>
    %160 = arith.subf %156, %159 : vector<8x24xf32>
    %161 = math.exp %160 : vector<8x24xf32>
    %cst_80 = arith.constant dense<0.000000e+00> : vector<8xf32>
    %162 = vector.multi_reduction <add>, %161, %cst_80 [1] : vector<8x24xf32> to vector<8xf32>
    %163 = vector.shape_cast %162 : vector<8xf32> to vector<8x1xf32>
    %164 = tpu.reciprocal %163 : vector<8x1xf32> -> vector<8x1xf32>
    %165 = vector.broadcast %164 : vector<8x1xf32> to vector<8x24xf32>
    %166 = arith.mulf %161, %165 : vector<8x24xf32>
    %167 = arith.addf %151, %166 : vector<8x24xf32>
    %cst_81 = arith.constant dense<0.000000e+00> : vector<8x8xf32>
    %168 = tpu.matmul %166, %155, %cst_81 {dimension_numbers = #tpu.dot_dimension_numbers<[1], [0], [0], [1], [0, 0, 1, 1], [], []>} : vector<8x24xf32>, vector<24x8xf32>, vector<8x8xf32> -> vector<8x8xf32>
    %169 = vector.extract_strided_slice %129 {offsets = [0, 16], sizes = [8, 8], strides = [1, 1]} : vector<8x32xf32> to vector<8x8xf32>
    %170 = vector.extract_strided_slice %132 {offsets = [0, 16], sizes = [24, 8], strides = [1, 1]} : vector<24x32xf32> to vector<24x8xf32>
    %171 = vector.extract_strided_slice %135 {offsets = [0, 16], sizes = [24, 8], strides = [1, 1]} : vector<24x32xf32> to vector<24x8xf32>
    %cst_82 = arith.constant dense<0.000000e+00> : vector<8x24xf32>
    %172 = tpu.matmul %169, %170, %cst_82 {dimension_numbers = #tpu.dot_dimension_numbers<[1], [1], [0], [0], [0, 0, 1, 0], [], []>} : vector<8x8xf32>, vector<24x8xf32>, vector<8x24xf32> -> vector<8x24xf32>
    %cst_83 = arith.constant dense<0xFF800000> : vector<8xf32>
    %173 = vector.multi_reduction <maximumf>, %172, %cst_83 [1] : vector<8x24xf32> to vector<8xf32>
    %174 = vector.shape_cast %173 : vector<8xf32> to vector<8x1xf32>
    %175 = vector.broadcast %174 : vector<8x1xf32> to vector<8x24xf32>
    %176 = arith.subf %172, %175 : vector<8x24xf32>
    %177 = math.exp %176 : vector<8x24xf32>
    %cst_84 = arith.constant dense<0.000000e+00> : vector<8xf32>
    %178 = vector.multi_reduction <add>, %177, %cst_84 [1] : vector<8x24xf32> to vector<8xf32>
    %179 = vector.shape_cast %178 : vector<8xf32> to vector<8x1xf32>
    %180 = tpu.reciprocal %179 : vector<8x1xf32> -> vector<8x1xf32>
    %181 = vector.broadcast %180 : vector<8x1xf32> to vector<8x24xf32>
    %182 = arith.mulf %177, %181 : vector<8x24xf32>
    %183 = arith.addf %167, %182 : vector<8x24xf32>
    %cst_85 = arith.constant dense<0.000000e+00> : vector<8x8xf32>
    %184 = tpu.matmul %182, %171, %cst_85 {dimension_numbers = #tpu.dot_dimension_numbers<[1], [0], [0], [1], [0, 0, 1, 1], [], []>} : vector<8x24xf32>, vector<24x8xf32>, vector<8x8xf32> -> vector<8x8xf32>
    %185 = vector.extract_strided_slice %129 {offsets = [0, 24], sizes = [8, 8], strides = [1, 1]} : vector<8x32xf32> to vector<8x8xf32>
    %186 = vector.extract_strided_slice %132 {offsets = [0, 24], sizes = [24, 8], strides = [1, 1]} : vector<24x32xf32> to vector<24x8xf32>
    %187 = vector.extract_strided_slice %135 {offsets = [0, 24], sizes = [24, 8], strides = [1, 1]} : vector<24x32xf32> to vector<24x8xf32>
    %cst_86 = arith.constant dense<0.000000e+00> : vector<8x24xf32>
    %188 = tpu.matmul %185, %186, %cst_86 {dimension_numbers = #tpu.dot_dimension_numbers<[1], [1], [0], [0], [0, 0, 1, 0], [], []>} : vector<8x8xf32>, vector<24x8xf32>, vector<8x24xf32> -> vector<8x24xf32>
    %cst_87 = arith.constant dense<0xFF800000> : vector<8xf32>
    %189 = vector.multi_reduction <maximumf>, %188, %cst_87 [1] : vector<8x24xf32> to vector<8xf32>
    %190 = vector.shape_cast %189 : vector<8xf32> to vector<8x1xf32>
    %191 = vector.broadcast %190 : vector<8x1xf32> to vector<8x24xf32>
    %192 = arith.subf %188, %191 : vector<8x24xf32>
    %193 = math.exp %192 : vector<8x24xf32>
    %cst_88 = arith.constant dense<0.000000e+00> : vector<8xf32>
    %194 = vector.multi_reduction <add>, %193, %cst_88 [1] : vector<8x24xf32> to vector<8xf32>
    %195 = vector.shape_cast %194 : vector<8xf32> to vector<8x1xf32>
    %196 = tpu.reciprocal %195 : vector<8x1xf32> -> vector<8x1xf32>
    %197 = vector.broadcast %196 : vector<8x1xf32> to vector<8x24xf32>
    %198 = arith.mulf %193, %197 : vector<8x24xf32>
    %199 = arith.addf %183, %198 : vector<8x24xf32>
    %cst_89 = arith.constant dense<0.000000e+00> : vector<8x8xf32>
    %200 = tpu.matmul %198, %187, %cst_89 {dimension_numbers = #tpu.dot_dimension_numbers<[1], [0], [0], [1], [0, 0, 1, 1], [], []>} : vector<8x24xf32>, vector<24x8xf32>, vector<8x8xf32> -> vector<8x8xf32>
    %201 = tpu.concatenate %152, %168, %184, %200 in 1 : vector<8x8xf32>, vector<8x8xf32>, vector<8x8xf32>, vector<8x8xf32> -> vector<8x32xf32>
    %cst_90 = arith.constant dense<0.000000e+00> : vector<8x32xf32>
    %202 = tpu.matmul %201, %125, %cst_90 {dimension_numbers = #tpu.dot_dimension_numbers<[1], [0], [0], [1], [0, 0, 1, 1], [], []>} : vector<8x32xf32>, vector<32x32xf32>, vector<8x32xf32> -> vector<8x32xf32>
    %203 = vector.broadcast %126 : vector<1x32xf32> to vector<8x32xf32>
    %204 = arith.addf %202, %203 : vector<8x32xf32>
    %cst_91 = arith.constant 2.500000e-01 : f32
    %205 = vector.broadcast %cst_91 : f32 to vector<8x24xf32>
    %206 = arith.mulf %199, %205 : vector<8x24xf32>
    %207 = arith.addf %118, %204 : vector<8x32xf32>
    %c0_92 = arith.constant 0 : index
    %c0_93 = arith.constant 0 : index
    %208 = vector.load %arg27[%c0_92, %c0_93] : memref<1x32xf32, #tpu.memory_space<vmem>>, vector<1x32xf32>
    %c0_94 = arith.constant 0 : index
    %c0_95 = arith.constant 0 : index
    %209 = vector.load %arg28[%c0_94, %c0_95] : memref<1x32xf32, #tpu.memory_space<vmem>>, vector<1x32xf32>
    %cst_96 = arith.constant dense<0.000000e+00> : vector<8xf32>
    %210 = vector.multi_reduction <add>, %207, %cst_96 [1] : vector<8x32xf32> to vector<8xf32>
    %211 = vector.shape_cast %210 : vector<8xf32> to vector<8x1xf32>
    %cst_97 = arith.constant 3.200000e+01 : f32
    %212 = vector.broadcast %cst_97 : f32 to vector<8x1xf32>
    %213 = arith.divf %211, %212 : vector<8x1xf32>
    %214 = vector.broadcast %213 : vector<8x1xf32> to vector<8x32xf32>
    %215 = arith.subf %207, %214 : vector<8x32xf32>
    %216 = arith.mulf %215, %215 : vector<8x32xf32>
    %cst_98 = arith.constant dense<0.000000e+00> : vector<8xf32>
    %217 = vector.multi_reduction <add>, %216, %cst_98 [1] : vector<8x32xf32> to vector<8xf32>
    %218 = vector.shape_cast %217 : vector<8xf32> to vector<8x1xf32>
    %cst_99 = arith.constant 3.200000e+01 : f32
    %219 = vector.broadcast %cst_99 : f32 to vector<8x1xf32>
    %220 = arith.divf %218, %219 : vector<8x1xf32>
    %221 = vector.broadcast %213 : vector<8x1xf32> to vector<8x32xf32>
    %222 = arith.subf %207, %221 : vector<8x32xf32>
    %cst_100 = arith.constant 9.99999997E-7 : f32
    %223 = vector.broadcast %cst_100 : f32 to vector<8x1xf32>
    %224 = arith.addf %220, %223 : vector<8x1xf32>
    %225 = math.rsqrt %224 : vector<8x1xf32>
    %226 = vector.broadcast %225 : vector<8x1xf32> to vector<8x32xf32>
    %227 = arith.mulf %222, %226 : vector<8x32xf32>
    %228 = vector.broadcast %208 : vector<1x32xf32> to vector<8x32xf32>
    %229 = arith.mulf %227, %228 : vector<8x32xf32>
    %230 = vector.broadcast %209 : vector<1x32xf32> to vector<8x32xf32>
    %231 = arith.addf %229, %230 : vector<8x32xf32>
    %c0_101 = arith.constant 0 : index
    %c0_102 = arith.constant 0 : index
    %232 = vector.load %arg21[%c0_101, %c0_102] : memref<32x64xf32, #tpu.memory_space<vmem>>, vector<32x64xf32>
    %cst_103 = arith.constant dense<0.000000e+00> : vector<8x64xf32>
    %233 = tpu.matmul %231, %232, %cst_103 {dimension_numbers = #tpu.dot_dimension_numbers<[1], [0], [0], [1], [0, 0, 1, 1], [], []>} : vector<8x32xf32>, vector<32x64xf32>, vector<8x64xf32> -> vector<8x64xf32>
    %c0_104 = arith.constant 0 : index
    %c0_105 = arith.constant 0 : index
    %234 = vector.load %arg22[%c0_104, %c0_105] : memref<1x64xf32, #tpu.memory_space<vmem>>, vector<1x64xf32>
    %235 = vector.broadcast %234 : vector<1x64xf32> to vector<8x64xf32>
    %236 = arith.addf %233, %235 : vector<8x64xf32>
    %cst_106 = arith.constant 0.000000e+00 : f32
    %237 = vector.broadcast %cst_106 : f32 to vector<8x64xf32>
    %238 = arith.maximumf %236, %237 : vector<8x64xf32>
    %c0_107 = arith.constant 0 : index
    %c0_108 = arith.constant 0 : index
    %239 = vector.load %arg23[%c0_107, %c0_108] : memref<64x32xf32, #tpu.memory_space<vmem>>, vector<64x32xf32>
    %cst_109 = arith.constant dense<0.000000e+00> : vector<8x32xf32>
    %240 = tpu.matmul %238, %239, %cst_109 {dimension_numbers = #tpu.dot_dimension_numbers<[1], [0], [0], [1], [0, 0, 1, 1], [], []>} : vector<8x64xf32>, vector<64x32xf32>, vector<8x32xf32> -> vector<8x32xf32>
    %c0_110 = arith.constant 0 : index
    %c0_111 = arith.constant 0 : index
    %241 = vector.load %arg24[%c0_110, %c0_111] : memref<1x32xf32, #tpu.memory_space<vmem>>, vector<1x32xf32>
    %242 = vector.broadcast %241 : vector<1x32xf32> to vector<8x32xf32>
    %243 = arith.addf %240, %242 : vector<8x32xf32>
    %244 = arith.addf %231, %243 : vector<8x32xf32>
    %c0_112 = arith.constant 0 : index
    %c0_113 = arith.constant 0 : index
    %245 = vector.load %arg29[%c0_112, %c0_113] : memref<1x32xf32, #tpu.memory_space<vmem>>, vector<1x32xf32>
    %c0_114 = arith.constant 0 : index
    %c0_115 = arith.constant 0 : index
    %246 = vector.load %arg30[%c0_114, %c0_115] : memref<1x32xf32, #tpu.memory_space<vmem>>, vector<1x32xf32>
    %cst_116 = arith.constant dense<0.000000e+00> : vector<8xf32>
    %247 = vector.multi_reduction <add>, %244, %cst_116 [1] : vector<8x32xf32> to vector<8xf32>
    %248 = vector.shape_cast %247 : vector<8xf32> to vector<8x1xf32>
    %cst_117 = arith.constant 3.200000e+01 : f32
    %249 = vector.broadcast %cst_117 : f32 to vector<8x1xf32>
    %250 = arith.divf %248, %249 : vector<8x1xf32>
    %251 = vector.broadcast %250 : vector<8x1xf32> to vector<8x32xf32>
    %252 = arith.subf %244, %251 : vector<8x32xf32>
    %253 = arith.mulf %252, %252 : vector<8x32xf32>
    %cst_118 = arith.constant dense<0.000000e+00> : vector<8xf32>
    %254 = vector.multi_reduction <add>, %253, %cst_118 [1] : vector<8x32xf32> to vector<8xf32>
    %255 = vector.shape_cast %254 : vector<8xf32> to vector<8x1xf32>
    %cst_119 = arith.constant 3.200000e+01 : f32
    %256 = vector.broadcast %cst_119 : f32 to vector<8x1xf32>
    %257 = arith.divf %255, %256 : vector<8x1xf32>
    %258 = vector.broadcast %250 : vector<8x1xf32> to vector<8x32xf32>
    %259 = arith.subf %244, %258 : vector<8x32xf32>
    %cst_120 = arith.constant 9.99999997E-7 : f32
    %260 = vector.broadcast %cst_120 : f32 to vector<8x1xf32>
    %261 = arith.addf %257, %260 : vector<8x1xf32>
    %262 = math.rsqrt %261 : vector<8x1xf32>
    %263 = vector.broadcast %262 : vector<8x1xf32> to vector<8x32xf32>
    %264 = arith.mulf %259, %263 : vector<8x32xf32>
    %265 = vector.broadcast %245 : vector<1x32xf32> to vector<8x32xf32>
    %266 = arith.mulf %264, %265 : vector<8x32xf32>
    %267 = vector.broadcast %246 : vector<1x32xf32> to vector<8x32xf32>
    %268 = arith.addf %266, %267 : vector<8x32xf32>
    %c0_121 = arith.constant 0 : index
    %c0_122 = arith.constant 0 : index
    %c0_123 = arith.constant 0 : index
    %269 = vector.load %arg31[%c0_121, %c0_122, %c0_123] : memref<1x8x32xf32, #tpu.memory_space<vmem>>, vector<1x8x32xf32>
    %270 = vector.shape_cast %269 : vector<1x8x32xf32> to vector<8x32xf32>
    %271 = vector.shape_cast %268 : vector<8x32xf32> to vector<1x8x32xf32>
    tpu.vector_store %arg31[%c0_121, %c0_122, %c0_123], %271 {strides = array<i32>} : memref<1x8x32xf32, #tpu.memory_space<vmem>>, vector<1x8x32xf32>,
    %cst_124 = arith.constant 0.000000e+00 : f32
    %272 = vector.broadcast %cst_124 : f32 to vector<8x112xf32>
    %273 = tpu.concatenate %93, %272 in 1 : vector<8x16xf32>, vector<8x112xf32> -> vector<8x128xf32>
    %c0_125 = arith.constant 0 : index
    %c0_126 = arith.constant 0 : index
    %c0_127 = arith.constant 0 : index
    %274 = vector.load %arg32[%c0_125, %c0_126, %c0_127] : memref<1x8x128xf32, #tpu.memory_space<vmem>>, vector<1x8x128xf32>
    %275 = vector.shape_cast %274 : vector<1x8x128xf32> to vector<8x128xf32>
    %276 = vector.shape_cast %273 : vector<8x128xf32> to vector<1x8x128xf32>
    tpu.vector_store %arg32[%c0_125, %c0_126, %c0_127], %276 {strides = array<i32>} : memref<1x8x128xf32, #tpu.memory_space<vmem>>, vector<1x8x128xf32>,
    %cst_128 = arith.constant 0.000000e+00 : f32
    %277 = vector.broadcast %cst_128 : f32 to vector<8x104xf32>
    %278 = tpu.concatenate %206, %277 in 1 : vector<8x24xf32>, vector<8x104xf32> -> vector<8x128xf32>
    %c0_129 = arith.constant 0 : index
    %c0_130 = arith.constant 0 : index
    %c0_131 = arith.constant 0 : index
    %279 = vector.load %arg33[%c0_129, %c0_130, %c0_131] : memref<1x8x128xf32, #tpu.memory_space<vmem>>, vector<1x8x128xf32>
    %280 = vector.shape_cast %279 : vector<1x8x128xf32> to vector<8x128xf32>
    %281 = vector.shape_cast %278 : vector<8x128xf32> to vector<1x8x128xf32>
    tpu.vector_store %arg33[%c0_129, %c0_130, %c0_131], %281 {strides = array<i32>} : memref<1x8x128xf32, #tpu.memory_space<vmem>>, vector<1x8x128xf32>,
    return
  }
  func.func @transform_0(%arg0: i32, %arg1: i32) -> (i32, i32, i32) {
    %c0_i32 = arith.constant 0 : i32
    %c0_i32_0 = arith.constant 0 : i32
    return %arg0, %arg1, %c0_i32 : i32, i32, i32
  }
  func.func @transform_1(%arg0: i32, %arg1: i32) -> (i32, i32, i32) {
    %c0_i32 = arith.constant 0 : i32
    %c0_i32_0 = arith.constant 0 : i32
    %c0_i32_1 = arith.constant 0 : i32
    return %arg0, %c0_i32, %c0_i32_0 : i32, i32, i32
  }
  func.func @transform_2(%arg0: i32, %arg1: i32) -> (i32, i32, i32) {
    %c0_i32 = arith.constant 0 : i32
    %c0_i32_0 = arith.constant 0 : i32
    %c0_i32_1 = arith.constant 0 : i32
    return %arg0, %c0_i32, %c0_i32_0 : i32, i32, i32
  }
  func.func @transform_3(%arg0: i32, %arg1: i32) -> (i32, i32) {
    %c0_i32 = arith.constant 0 : i32
    %c0_i32_0 = arith.constant 0 : i32
    %c0_i32_1 = arith.constant 0 : i32
    return %c0_i32, %c0_i32_0 : i32, i32
  }
  func.func @transform_4(%arg0: i32, %arg1: i32) -> (i32, i32) {
    %c0_i32 = arith.constant 0 : i32
    %c0_i32_0 = arith.constant 0 : i32
    %c0_i32_1 = arith.constant 0 : i32
    return %c0_i32, %c0_i32_0 : i32, i32
  }
  func.func @transform_5(%arg0: i32, %arg1: i32) -> (i32, i32) {
    %c0_i32 = arith.constant 0 : i32
    %c0_i32_0 = arith.constant 0 : i32
    %c0_i32_1 = arith.constant 0 : i32
    return %c0_i32, %c0_i32_0 : i32, i32
  }
  func.func @transform_6(%arg0: i32, %arg1: i32) -> (i32, i32) {
    %c0_i32 = arith.constant 0 : i32
    %c0_i32_0 = arith.constant 0 : i32
    %c0_i32_1 = arith.constant 0 : i32
    return %c0_i32, %c0_i32_0 : i32, i32
  }
  func.func @transform_7(%arg0: i32, %arg1: i32) -> (i32, i32) {
    %c0_i32 = arith.constant 0 : i32
    %c0_i32_0 = arith.constant 0 : i32
    %c0_i32_1 = arith.constant 0 : i32
    return %c0_i32, %c0_i32_0 : i32, i32
  }
  func.func @transform_8(%arg0: i32, %arg1: i32) -> (i32, i32) {
    %c0_i32 = arith.constant 0 : i32
    %c0_i32_0 = arith.constant 0 : i32
    %c0_i32_1 = arith.constant 0 : i32
    return %c0_i32, %c0_i32_0 : i32, i32
  }
  func.func @transform_9(%arg0: i32, %arg1: i32) -> (i32, i32) {
    %c0_i32 = arith.constant 0 : i32
    %c0_i32_0 = arith.constant 0 : i32
    %c0_i32_1 = arith.constant 0 : i32
    return %c0_i32, %c0_i32_0 : i32, i32
  }
  func.func @transform_10(%arg0: i32, %arg1: i32) -> (i32, i32) {
    %c0_i32 = arith.constant 0 : i32
    %c0_i32_0 = arith.constant 0 : i32
    %c0_i32_1 = arith.constant 0 : i32
    return %c0_i32, %c0_i32_0 : i32, i32
  }
  func.func @transform_11(%arg0: i32, %arg1: i32) -> (i32, i32) {
    %c0_i32 = arith.constant 0 : i32
    %c0_i32_0 = arith.constant 0 : i32
    %c0_i32_1 = arith.constant 0 : i32
    return %c0_i32, %c0_i32_0 : i32, i32
  }
  func.func @transform_12(%arg0: i32, %arg1: i32) -> (i32, i32) {
    %c0_i32 = arith.constant 0 : i32
    %c0_i32_0 = arith.constant 0 : i32
    %c0_i32_1 = arith.constant 0 : i32
    return %c0_i32, %c0_i32_0 : i32, i32
  }
  func.func @transform_13(%arg0: i32, %arg1: i32) -> (i32, i32) {
    %c0_i32 = arith.constant 0 : i32
    %c0_i32_0 = arith.constant 0 : i32
    %c0_i32_1 = arith.constant 0 : i32
    return %c0_i32, %c0_i32_0 : i32, i32
  }
  func.func @transform_14(%arg0: i32, %arg1: i32) -> (i32, i32) {
    %c0_i32 = arith.constant 0 : i32
    %c0_i32_0 = arith.constant 0 : i32
    %c0_i32_1 = arith.constant 0 : i32
    return %c0_i32, %c0_i32_0 : i32, i32
  }
  func.func @transform_15(%arg0: i32, %arg1: i32) -> (i32, i32) {
    %c0_i32 = arith.constant 0 : i32
    %c0_i32_0 = arith.constant 0 : i32
    %c0_i32_1 = arith.constant 0 : i32
    return %c0_i32, %c0_i32_0 : i32, i32
  }
  func.func @transform_16(%arg0: i32, %arg1: i32) -> (i32, i32) {
    %c0_i32 = arith.constant 0 : i32
    %c0_i32_0 = arith.constant 0 : i32
    %c0_i32_1 = arith.constant 0 : i32
    return %c0_i32, %c0_i32_0 : i32, i32
  }
  func.func @transform_17(%arg0: i32, %arg1: i32) -> (i32, i32) {
    %c0_i32 = arith.constant 0 : i32
    %c0_i32_0 = arith.constant 0 : i32
    %c0_i32_1 = arith.constant 0 : i32
    return %c0_i32, %c0_i32_0 : i32, i32
  }
  func.func @transform_18(%arg0: i32, %arg1: i32) -> (i32, i32) {
    %c0_i32 = arith.constant 0 : i32
    %c0_i32_0 = arith.constant 0 : i32
    %c0_i32_1 = arith.constant 0 : i32
    return %c0_i32, %c0_i32_0 : i32, i32
  }
  func.func @transform_19(%arg0: i32, %arg1: i32) -> (i32, i32) {
    %c0_i32 = arith.constant 0 : i32
    %c0_i32_0 = arith.constant 0 : i32
    %c0_i32_1 = arith.constant 0 : i32
    return %c0_i32, %c0_i32_0 : i32, i32
  }
  func.func @transform_20(%arg0: i32, %arg1: i32) -> (i32, i32) {
    %c0_i32 = arith.constant 0 : i32
    %c0_i32_0 = arith.constant 0 : i32
    %c0_i32_1 = arith.constant 0 : i32
    return %c0_i32, %c0_i32_0 : i32, i32
  }
  func.func @transform_21(%arg0: i32, %arg1: i32) -> (i32, i32) {
    %c0_i32 = arith.constant 0 : i32
    %c0_i32_0 = arith.constant 0 : i32
    %c0_i32_1 = arith.constant 0 : i32
    return %c0_i32, %c0_i32_0 : i32, i32
  }
  func.func @transform_22(%arg0: i32, %arg1: i32) -> (i32, i32) {
    %c0_i32 = arith.constant 0 : i32
    %c0_i32_0 = arith.constant 0 : i32
    %c0_i32_1 = arith.constant 0 : i32
    return %c0_i32, %c0_i32_0 : i32, i32
  }
  func.func @transform_23(%arg0: i32, %arg1: i32) -> (i32, i32) {
    %c0_i32 = arith.constant 0 : i32
    %c0_i32_0 = arith.constant 0 : i32
    %c0_i32_1 = arith.constant 0 : i32
    return %c0_i32, %c0_i32_0 : i32, i32
  }
  func.func @transform_24(%arg0: i32, %arg1: i32) -> (i32, i32) {
    %c0_i32 = arith.constant 0 : i32
    %c0_i32_0 = arith.constant 0 : i32
    %c0_i32_1 = arith.constant 0 : i32
    return %c0_i32, %c0_i32_0 : i32, i32
  }
  func.func @transform_25(%arg0: i32, %arg1: i32) -> (i32, i32) {
    %c0_i32 = arith.constant 0 : i32
    %c0_i32_0 = arith.constant 0 : i32
    %c0_i32_1 = arith.constant 0 : i32
    return %c0_i32, %c0_i32_0 : i32, i32
  }
  func.func @transform_26(%arg0: i32, %arg1: i32) -> (i32, i32) {
    %c0_i32 = arith.constant 0 : i32
    %c0_i32_0 = arith.constant 0 : i32
    %c0_i32_1 = arith.constant 0 : i32
    return %c0_i32, %c0_i32_0 : i32, i32
  }
  func.func @transform_27(%arg0: i32, %arg1: i32) -> (i32, i32) {
    %c0_i32 = arith.constant 0 : i32
    %c0_i32_0 = arith.constant 0 : i32
    %c0_i32_1 = arith.constant 0 : i32
    return %c0_i32, %c0_i32_0 : i32, i32
  }
  func.func @transform_28(%arg0: i32, %arg1: i32) -> (i32, i32) {
    %c0_i32 = arith.constant 0 : i32
    %c0_i32_0 = arith.constant 0 : i32
    %c0_i32_1 = arith.constant 0 : i32
    return %c0_i32, %c0_i32_0 : i32, i32
  }
  func.func @transform_29(%arg0: i32, %arg1: i32) -> (i32, i32, i32) {
    %c0_i32 = arith.constant 0 : i32
    %c0_i32_0 = arith.constant 0 : i32
    return %arg0, %arg1, %c0_i32 : i32, i32, i32
  }
  func.func @transform_30(%arg0: i32, %arg1: i32) -> (i32, i32, i32) {
    %c0_i32 = arith.constant 0 : i32
    %c0_i32_0 = arith.constant 0 : i32
    return %arg0, %arg1, %c0_i32 : i32, i32, i32
  }
  func.func @transform_31(%arg0: i32, %arg1: i32) -> (i32, i32, i32) {
    %c0_i32 = arith.constant 0 : i32
    %c0_i32_0 = arith.constant 0 : i32
    return %arg0, %arg1, %c0_i32 : i32, i32, i32
  }
}

</mosaic_0001>

<bundles_post_ra>
// kernel: tpu_custom_call.1
= control target key start
LH: loop header
LB: loop body
LE: loop exit
PB: predicated region body
PF: predicated region fallthrough
CT: control target
= control target key end

     0   :  { %s5188_s6 = smov 1   ;;  %s5189_s10 = smov 2   ;;  %s6158_s0 = inlined_call_operand.smem [shape: u32[32], index: -1, kind: input, shape index: {}] }
   0x1   :  { %s5250_s5 = sld [smem:[%s6158_s0]]   ;;  %s5190_s14 = smov 3  }
   0x2   :  { %s5255_s9 = sld [smem:[%s6158_s0 + %s5188_s6]]   ;;  %s5191_s18 = smov 4  }
   0x3   :  { %s5260_s13 = sld [smem:[%s6158_s0 + %s5189_s10]]   ;;  %s5192_s22 = smov 5  }
   0x4   :  { %s5265_s17 = sld [smem:[%s6158_s0 + %s5190_s14]]   ;;  %s5193_s26 = smov 6  }
   0x5   :  { %s5270_s21 = sld [smem:[%s6158_s0 + %s5191_s18]]   ;;  %s5194_s30 = smov 7  }
   0x6   :  { %s5275_s25 = sld [smem:[%s6158_s0 + %s5192_s22]]   ;;  %s5195_s4 = smov 8  }
   0x7   :  { %6176 = sst [smem:[#allocation31_spill]] %s5250_s5  ;;  %s5196_s10 = smov 9  }
   0x8   :  { %6177 = sst [smem:[#allocation32_spill]] %s5255_s9  ;;  %s5197_s15 = smov 10  }
   0x9   :  { %6178 = sst [smem:[#allocation33_spill]] %s5260_s13  ;;  %s5198_s20 = smov 11  }
   0xa   :  { %6179 = sst [smem:[#allocation34_spill]] %s5265_s17  ;;  %s5200_s1 = smov 13  }
   0xb   :  { %6180 = sst [smem:[#allocation35_spill]] %s5270_s21  ;;  %s5201_s7 = smov 14  }
   0xc   :  { %s5280_s29 = sld [smem:[%s6158_s0 + %s5193_s26]]   ;;  %s5199_s26 = smov 12  }
   0xd   :  { %s5285_s3 = sld [smem:[%s6158_s0 + %s5194_s30]]   ;;  %s5203_s22 = smov 16  }
   0xe   :  { %s5290_s8 = sld [smem:[%s6158_s0 + %s5195_s4]]   ;;  %s5204_s28 = smov 17  }
   0xf   :  { %s5295_s14 = sld [smem:[%s6158_s0 + %s5196_s10]]  }
  0x10   :  { %s5300_s19 = sld [smem:[%s6158_s0 + %s5197_s15]]   ;;  %s5202_s15 = smov 15  }
  0x11   :  { %s5305_s24 = sld [smem:[%s6158_s0 + %s5198_s20]]  }
  0x12   :  { %6181 = sst [smem:[#allocation36_spill]] %s5280_s29 }
  0x13   :  { %6182 = sst [smem:[#allocation37_spill]] %s5285_s3 }
  0x14   :  { %6183 = sst [smem:[#allocation38_spill]] %s5290_s8 }
  0x15   :  { %6184 = sst [smem:[#allocation39_spill]] %s5295_s14 }
  0x16   :  { %6185 = sst [smem:[#allocation40_spill]] %s5300_s19 }
  0x17   :  { %6186 = sst [smem:[#allocation41_spill]] %s5305_s24 }
  0x18   :  { %s5310_s30 = sld [smem:[%s6158_s0 + %s5199_s26]]  }
  0x19   :  { %s5315_s6 = sld [smem:[%s6158_s0 + %s5200_s1]]  }
  0x1a   :  { %s5320_s12 = sld [smem:[%s6158_s0 + %s5201_s7]]   ;;  %s5205_s7 = smov 18  }
  0x1b   :  { %s5325_s20 = sld [smem:[%s6158_s0 + %s5202_s15]]   ;;  %s5206_s15 = smov 19  }
  0x1c   :  { %s5330_s27 = sld [smem:[%s6158_s0 + %s5203_s22]]   ;;  %s5207_s22 = smov 20  }
  0x1d   :  { %s5335_s4 = sld [smem:[%s6158_s0 + %s5204_s28]]   ;;  %s5208_s28 = smov 21  }
  0x1e   :  { %6187 = sst [smem:[#allocation42_spill]] %s5310_s30 }
  0x1f   :  { %6188 = sst [smem:[#allocation43_spill]] %s5315_s6 }
  0x20   :  { %6189 = sst [smem:[#allocation44_spill]] %s5320_s12 }
  0x21   :  { %6190 = sst [smem:[#allocation45_spill]] %s5325_s20 }
  0x22   :  { %6191 = sst [smem:[#allocation46_spill]] %s5330_s27 }
  0x23   :  { %6192 = sst [smem:[#allocation47_spill]] %s5335_s4 }
  0x24   :  { %s5340_s30 = sld [smem:[%s6158_s0 + %s5205_s7]]   ;;  %s5209_s7 = smov 22  }
  0x25   :  { %s5345_s12 = sld [smem:[%s6158_s0 + %s5206_s15]]   ;;  %s5210_s15 = smov 23  }
  0x26   :  { %s5350_s27 = sld [smem:[%s6158_s0 + %s5207_s22]]   ;;  %s5211_s22 = smov 24  }
  0x27   :  { %s5355_s13 = sld [smem:[%s6158_s0 + %s5208_s28]]   ;;  %s5212_s28 = smov 25  }
  0x28   :  { %s5365_s19 = sld [smem:[%s6158_s0 + %s5210_s15]]   ;;  %s5214_s15 = smov 27  }
  0x2a   :  { %6193 = sst [smem:[#allocation48_spill]] %s5340_s30 }
  0x2b   :  { %6194 = sst [smem:[#allocation49_spill]] %s5345_s12 }
  0x2c   :  { %6195 = sst [smem:[#allocation50_spill]] %s5350_s27 }
  0x2d   :  { %6196 = sst [smem:[#allocation51_spill]] %s5355_s13 }
  0x2e   :  { %s5360_s30 = sld [smem:[%s6158_s0 + %s5209_s7]]   ;;  %s5213_s7 = smov 26  }
  0x2f   :  { %6198 = sst [smem:[#allocation53_spill]] %s5365_s19 }
  0x30   :  { %s5370_s27 = sld [smem:[%s6158_s0 + %s5211_s22]]   ;;  %s5215_s22 = smov 28  }
  0x31   :  { %s5375_s13 = sld [smem:[%s6158_s0 + %s5212_s28]]   ;;  %s5216_s28 = smov 29  }
  0x32   :  { %s5385_s19 = sld [smem:[%s6158_s0 + %s5214_s15]]   ;;  %s5218_s15 = smov 31  }
  0x34   :  { %6197 = sst [smem:[#allocation52_spill]] %s5360_s30 }
  0x35   :  { %s5380_s30 = sld [smem:[%s6158_s0 + %s5213_s7]]   ;;  %s5217_s7 = smov 30  }
  0x36   :  { %6199 = sst [smem:[#allocation54_spill]] %s5370_s27 }
  0x37   :  { %6200 = sst [smem:[#allocation55_spill]] %s5375_s13 }
  0x38   :  { %6202 = sst [smem:[#allocation57_spill]] %s5385_s19 }
  0x39   :  { %s5390_s27 = sld [smem:[%s6158_s0 + %s5215_s22]]  }
  0x3a   :  { %s5395_s13 = sld [smem:[%s6158_s0 + %s5216_s28]]  }
  0x3b   :  { %6201 = sst [smem:[#allocation56_spill]] %s5380_s30 }
  0x3c   :  { %s5400_s30 = sld [smem:[%s6158_s0 + %s5217_s7]]  }
  0x3d   :  { %s5405_s19 = sld [smem:[%s6158_s0 + %s5218_s15]]  }
  0x3f   :  { %6203 = sst [smem:[#allocation58_spill]] %s5390_s27 }
  0x40   :  { %6204 = sst [smem:[#allocation59_spill]] %s5395_s13 }
  0x42   :  { %6205 = sst [smem:[#allocation60_spill]] %s5400_s30 }
  0x43   :  { %6206 = sst [smem:[#allocation61_spill]] %s5405_s19 }
  0x44   :  { %69 = vsyncpa [#allocation3], 0 }
  0x45   :  { %71 = vsyncpa [#allocation3 + $0x1], 0 }
  0x46   :  { %72 = vsyncpa [#allocation6], 0 }
  0x47   :  { %73 = vsyncpa [#allocation9], 0 }
  0x48   :  { %74 = vsyncpa [#allocation12], 0 }
  0x49   :  { %75 = vsyncpa [#allocation15], 0 }
  0x4a   :  { %76 = vsyncpa [#allocation18], 0 }
  0x4b   :  { %77 = vsyncpa [#allocation4], 0 }
  0x4c   :  { %79 = vsyncpa [#allocation4 + $0x1], 0 }
  0x4d   :  { %80 = vsyncpa [#allocation21], 0 }
  0x4e   :  { %82 = vsyncpa [#allocation21 + $0x1], 0  ;;  %s5407_s22 = smov 0   ;;  %s5409_s23 = smov 0  }
  0x4f   :  { %s5411_s26 = smov 0   ;;  %s5413_s28 = smov 0  }
  0x50   :  { %s5415_s0 = smov 0   ;;  %s5417_s1 = smov 0  }
  0x51   :  { %s5419_s2 = smov 0   ;;  %s5421_s7 = smov 0  }
  0x52   :  { %s5423_s10 = smov 0   ;;  %s5425_s11 = smov 0  }
  0x53   :  { %s5427_s15 = smov 0  }
  0x54 LB: > { %s6207_s9 = sld [smem:[#allocation32_spill]]  ;;  %s5463_s16 = sadd.s32 4294967295, %s5186_s15   ;;  %s5146_s22 = sphi %s5407_s22, %s6271_s22   ;;  %s5186_s15 = sphi %s5427_s15, %s88_s15   ;;  %s5182_s11 = sphi %s5425_s11, %s6280_s11   ;;  %s5178_s10 = sphi %s5423_s10, %s6279_s10   ;;  %s5174_s7 = sphi %s5421_s7, %s6278_s7   ;;  %s5170_s2 = sphi %s5419_s2, %s6277_s2   ;;  %s5166_s1 = sphi %s5417_s1, %s6276_s1   ;;  %s5162_s0 = sphi %s5415_s0, %s6275_s0   ;;  %s5158_s28 = sphi %s5413_s28, %s6274_s28   ;;  %s5154_s26 = sphi %s5411_s26, %s6273_s26   ;;  %s5150_s23 = sphi %s5409_s23, %s6272_s23  }
  0x55   : > { %6208 = sst [smem:[#allocation62_spill]] %s5170_s2  ;;  %p3960_p0 = scmp.ge.s32.totalorder %s5186_s15, 1 }
  0x56   : > { %p6164_p1 = scmp.eq.s32.totalorder %s5463_s16, 0  ;;  %p815_p2 = scmp.lt.s32.totalorder %s5186_s15, 5 }
  0x57   : > { %s5219_s13 = smov [#allocation5]   ;;  %s5220_s30 = smov [#allocation8]  }
  0x58   : > { %p5468_p3 = pnand %p3960_p0, %p815_p2  ;;  %s827_s27 = sshll.u32 %s5219_s13, 4  ;;  %s828_s27 = int_to_ptr.vmem [resolvable:$true] %s827_s27 }
  0x59   : > { %s859_s8 = sshll.u32 %s5220_s30, 4  ;;  %s5221_s21 = smov [#allocation11]   ;;  %s860_s8 = int_to_ptr.vmem [resolvable:$true] %s859_s8 }
  0x5a   : > { %s6209_s18 = scalar_select %p5468_p3, 1, 0 }
  0x5b   : > { %p4490_p4 = pneg %p5468_p3  ;;  %s891_s29 = sshll.u32 %s5221_s21, 4  ;;  %s892_s29 = int_to_ptr.vmem [resolvable:$true] %s891_s29 }
  0x5c   : > { %s4739_s13 = scalar_lea.vmem %s828_s27, 512  ;;  %p4747_p10 = scmp.lt.s32.totalorder %s828_s27, %s828_s27 }
  0x5d   : > { %p5476_p5 = pnand %p4490_p4, %p6164_p1  ;;  %p4740_p7 = scmp.ne.s32.totalorder %s828_s27, %s4739_s13 }
  0x5e   : > { %p4748_p11 = scmp.lt.s32.totalorder %s4739_s13, %s4739_s13 }
  0x5f   : > { %p5482_p6 = pneg %p5476_p5 }
  0x60   : > { %p4749_p12 = por %p4748_p11, %p4747_p10 }
  0x61   : > { %p4742_p8 = pnand %p4740_p7, %p5482_p6 }
  0x63   : > { %p4743_p9 = pneg %p4742_p8 }
  0x65   : > { %p4750_p13 = pnand %p4749_p12, %p4743_p9 }
  0x67   : > { %4753 = shalt.err (!%p4750_p13)
}
  0x68   : > { %s6165_s30 = smov 128   ;;  %s6212_s17 = sld [smem:[#allocation34_spill]] }
  0x69   : > { %s6166_s21 = smov 8   ;;  %s4765_s2 = scalar_lea.vmem %s860_s8, 512 }
  0x6a   : > { %p4766_p0 = scmp.ne.s32.totalorder %s860_s8, %s4765_s2  ;;  %p4773_p7 = scmp.lt.s32.totalorder %s860_s8, %s860_s8 }
  0x6b   : > { %p4774_p8 = scmp.lt.s32.totalorder %s4765_s2, %s4765_s2 }
  0x6c   : > { %p4768_p2 = pnand %p4766_p0, %p5482_p6 }
  0x6d   : > { %p4775_p10 = por %p4774_p8, %p4773_p7 }
  0x6e   : > { %4493 = dma.hbm_to_vmem [thread:$0]  (!%p5476_p5), %s6212_s17, 512, %s828_s27, [#allocation6], %s6165_s30, %s6165_s30, %s6166_s21  }
  0x6f   : > { %p4769_p4 = pneg %p4768_p2 }
  0x71   : > { %p4776_p9 = pnand %p4775_p10, %p4769_p4 }
  0x73   : > { %4779 = shalt.err (!%p4776_p9)
}
  0x74   : > { %s6213_s3 = sld [smem:[#allocation37_spill]]  ;;  %s4791_s27 = scalar_lea.vmem %s892_s29, 512 }
  0x75   : > { %p4792_p11 = scmp.ne.s32.totalorder %s892_s29, %s4791_s27  ;;  %p4799_p0 = scmp.lt.s32.totalorder %s892_s29, %s892_s29 }
  0x76   : > { %p4800_p2 = scmp.lt.s32.totalorder %s4791_s27, %s4791_s27 }
  0x77   : > { %p4794_p12 = pnand %p4792_p11, %p5482_p6 }
  0x78   : > { %p4801_p1 = por %p4800_p2, %p4799_p0 }
  0x79   : > { %p4795_p13 = pneg %p4794_p12 }
  0x7a   : > { %4499 = dma.hbm_to_vmem [thread:$0]  (!%p5476_p5), %s6213_s3, 512, %s860_s8, [#allocation9], %s6165_s30, %s6165_s30, %s6166_s21  }
  0x7b   : > { %p4802_p7 = pnand %p4801_p1, %p4795_p13 }
  0x7d   : > { %4805 = shalt.err (!%p4802_p7)
}
  0x7e   : > { %s6214_s24 = sld [smem:[#allocation41_spill]]  ;;  %s5224_s8 = smov [#allocation14]  }
  0x7f   : > { %s923_s2 = sshll.u32 %s5224_s8, 4  ;;  %s5225_s13 = smov [#allocation7]   ;;  %s924_s2 = int_to_ptr.vmem [resolvable:$true] %s923_s2 }
  0x80   : > { %s843_s3 = sshll.u32 %s5225_s13, 4  ;;  %s4817_s17 = scalar_lea.vmem %s924_s2, 512  ;;  %s844_s3 = int_to_ptr.vmem [resolvable:$true] %s843_s3 }
  0x81   : > { %p4818_p4 = scmp.ne.s32.totalorder %s924_s2, %s4817_s17  ;;  %p4825_p1 = scmp.lt.s32.totalorder %s924_s2, %s924_s2 }
  0x82   : > { %p4826_p9 = scmp.lt.s32.totalorder %s4817_s17, %s4817_s17 }
  0x83   : > { %p4820_p8 = pnand %p4818_p4, %p5482_p6 }
  0x84   : > { %4505 = dma.hbm_to_vmem [thread:$0]  (!%p5476_p5), %s6214_s24, 512, %s892_s29, [#allocation12], %s6165_s30, %s6165_s30, %s6166_s21  }
  0x85   : > { %p4821_p10 = pneg %p4820_p8  ;;  %p4827_p11 = por %p4826_p9, %p4825_p1 }
  0x87   : > { %p4828_p12 = pnand %p4827_p11, %p4821_p10 }
  0x89   : > { %4831 = shalt.err (!%p4828_p12)
}
  0x8a   : > { %s6215_s20 = sld [smem:[#allocation45_spill]]  ;;  %s4843_s29 = scalar_lea.vmem %s844_s3, 512 }
  0x8b   : > { %p4844_p13 = scmp.ne.s32.totalorder %s844_s3, %s4843_s29  ;;  %p4851_p7 = scmp.lt.s32.totalorder %s844_s3, %s844_s3 }
  0x8c   : > { %p4852_p4 = scmp.lt.s32.totalorder %s4843_s29, %s4843_s29 }
  0x8d   : > { %p4846_p0 = pnand %p4844_p13, %p5482_p6 }
  0x8e   : > { %p4853_p8 = por %p4852_p4, %p4851_p7 }
  0x8f   : > { %p4847_p2 = pneg %p4846_p0 }
  0x90   : > { %4511 = dma.hbm_to_vmem [thread:$0]  (!%p5476_p5), %s6215_s20, 512, %s924_s2, [#allocation15], %s6165_s30, %s6165_s30, %s6166_s21  }
  0x91   : > { %p4854_p1 = pnand %p4853_p8, %p4847_p2 }
  0x93   : > { %4857 = shalt.err (!%p4854_p1)
}
  0x94   : > { %4496 = dma.hbm_to_vmem [thread:$0]  (!%p5476_p5), %s5275_s25, 512, %s844_s3, [#allocation6], %s6165_s30, %s6165_s30, %s6166_s21  }
  0x95   : > { %s5226_s17 = smov [#allocation10]   ;;  %s5227_s8 = smov [#allocation13]  }
  0x96   : > { %s875_s27 = sshll.u32 %s5226_s17, 4  ;;  %s907_s2 = sshll.u32 %s5227_s8, 4  ;;  %s876_s27 = int_to_ptr.vmem [resolvable:$true] %s875_s27  ;;  %s908_s2 = int_to_ptr.vmem [resolvable:$true] %s907_s2 }
  0x97   : > { %s4869_s13 = scalar_lea.vmem %s876_s27, 512  ;;  %p4877_p12 = scmp.lt.s32.totalorder %s876_s27, %s876_s27 }
  0x98   : > { %p4870_p10 = scmp.ne.s32.totalorder %s876_s27, %s4869_s13  ;;  %p4878_p13 = scmp.lt.s32.totalorder %s4869_s13, %s4869_s13 }
  0x9a   : > { %p4872_p9 = pnand %p4870_p10, %p5482_p6  ;;  %p4879_p0 = por %p4878_p13, %p4877_p12 }
  0x9c   : > { %p4873_p11 = pneg %p4872_p9 }
  0x9e   : > { %p4880_p2 = pnand %p4879_p0, %p4873_p11 }
  0xa0   : > { %4883 = shalt.err (!%p4880_p2)
}
  0xa1   : > { %s6216_s14 = sld [smem:[#allocation39_spill]]  ;;  %s4895_s3 = scalar_lea.vmem %s908_s2, 512 }
  0xa2   : > { %p4896_p7 = scmp.ne.s32.totalorder %s908_s2, %s4895_s3  ;;  %p4903_p1 = scmp.lt.s32.totalorder %s908_s2, %s908_s2 }
  0xa3   : > { %p4904_p10 = scmp.lt.s32.totalorder %s4895_s3, %s4895_s3 }
  0xa4   : > { %p4898_p4 = pnand %p4896_p7, %p5482_p6 }
  0xa5   : > { %p4905_p9 = por %p4904_p10, %p4903_p1 }
  0xa6   : > { %p4899_p8 = pneg %p4898_p4 }
  0xa7   : > { %4502 = dma.hbm_to_vmem [thread:$0]  (!%p5476_p5), %s6216_s14, 512, %s876_s27, [#allocation9], %s6165_s30, %s6165_s30, %s6166_s21  }
  0xa8   : > { %p4906_p12 = pnand %p4905_p9, %p4899_p8 }
  0xaa   : > { %4909 = shalt.err (!%p4906_p12)
}
  0xab   : > { %s6217_s6 = sld [smem:[#allocation43_spill]]  ;;  %s5228_s29 = smov [#allocation16]  }
  0xac   : > { %s939_s17 = sshll.u32 %s5228_s29, 4  ;;  %s5229_s27 = smov [#allocation17]   ;;  %s940_s17 = int_to_ptr.vmem [resolvable:$true] %s939_s17 }
  0xad   : > { %s955_s8 = sshll.u32 %s5229_s27, 4  ;;  %s4921_s13 = scalar_lea.vmem %s940_s17, 512  ;;  %s956_s8 = int_to_ptr.vmem [resolvable:$true] %s955_s8 }
  0xae   : > { %p4922_p11 = scmp.ne.s32.totalorder %s940_s17, %s4921_s13  ;;  %p4929_p2 = scmp.lt.s32.totalorder %s940_s17, %s940_s17 }
  0xaf   : > { %p4930_p7 = scmp.lt.s32.totalorder %s4921_s13, %s4921_s13 }
  0xb0   : > { %p4924_p13 = pnand %p4922_p11, %p5482_p6 }
  0xb1   : > { %4508 = dma.hbm_to_vmem [thread:$0]  (!%p5476_p5), %s6217_s6, 512, %s908_s2, [#allocation12], %s6165_s30, %s6165_s30, %s6166_s21  }
  0xb2   : > { %p4925_p0 = pneg %p4924_p13  ;;  %p4931_p4 = por %p4930_p7, %p4929_p2 }
  0xb4   : > { %p4932_p8 = pnand %p4931_p4, %p4925_p0 }
  0xb6   : > { %4935 = shalt.err (!%p4932_p8)
}
  0xb7   : > { %s6218_s4 = sld [smem:[#allocation47_spill]]  ;;  %s4947_s2 = scalar_lea.vmem %s956_s8, 512 }
  0xb8   : > { %p4948_p1 = scmp.ne.s32.totalorder %s956_s8, %s4947_s2  ;;  %p4955_p12 = scmp.lt.s32.totalorder %s956_s8, %s956_s8 }
  0xb9   : > { %p4956_p11 = scmp.lt.s32.totalorder %s4947_s2, %s4947_s2 }
  0xba   : > { %p4950_p10 = pnand %p4948_p1, %p5482_p6 }
  0xbb   : > { %p4957_p13 = por %p4956_p11, %p4955_p12 }
  0xbc   : > { %p4951_p9 = pneg %p4950_p10 }
  0xbd   : > { %4514 = dma.hbm_to_vmem [thread:$0]  (!%p5476_p5), %s6218_s4, 512, %s940_s17, [#allocation15], %s6165_s30, %s6165_s30, %s6166_s21  }
  0xbe   : > { %p4958_p2 = pnand %p4957_p13, %p4951_p9 }
  0xc0   : > { %4961 = shalt.err (!%p4958_p2)
}
  0xc1   : > { %s6219_s12 = sld [smem:[#allocation49_spill]]  ;;  %s97_s19 = sadd.s32 1, %s5178_s10 }
  0xc2   : > { %s100_s3 = sadd.s32 1, %s5182_s11  ;;  %p98_p6 = scmp.ge.s32.totalorder %s97_s19, 2 }
  0xc3   : > { %s135_s29 = sadd.s32 1, %s5166_s1  ;;  %p142_p0 = scmp.ne.s32.totalorder %s5166_s1, %s5162_s0 }
  0xc4   : > { %p143_p7 = scmp.eq.s32.totalorder %s5186_s15, 0  ;;  %s6282_s19 = smov (%p98_p6, %s97_s19), 0 }
  0xc5   : > { %s6284_s3 = smov (!%p98_p6, %s100_s3), %s5182_s11  ;;  %s731_s27 = ssub.s32 %s5178_s10, %s6282_s19 }
  0xc6   : > { %p5568_p4 = por %p143_p7, %p142_p0  ;;  %p102_p8 = scmp.ge.s32.totalorder %s6284_s3, 2 }
  0xc7   : > { %4517 = dma.hbm_to_vmem [thread:$0]  (!%p5476_p5), %s6219_s12, 512, %s956_s8, [#allocation18], %s6165_s30, %s6165_s30, %s6166_s21  }
  0xc8   : > { %p148_p5 = scmp.ne.s32.totalorder %s5162_s0, %s5158_s28  ;;  %p6221_p1 = scmp.eq.s32.totalorder %s5463_s16, 0 }
  0xc9   : > { %s735_s13 = sadd.s32 1, %s5154_s26  ;;  %s6286_s3 = smov (%p102_p8, %s6284_s3), 0 }
  0xca   : > { %p5578_p10 = por %p6221_p1, %p148_p5  ;;  %p745_p9 = scmp.ne.s32.totalorder %s5154_s26, %s5150_s23 }
  0xcb   : > { %p746_p12 = scmp.eq.s32.totalorder %s5463_s16, 3  ;;  %s132_s28 = ssub.s32 %s5182_s11, %s6286_s3 }
  0xcc   : > { %s6222_s8 = scalar_select %p5578_p10, 1, 0 }
  0xcd   : > { %p751_p11 = scmp.ne.s32.totalorder %s5150_s23, %s5146_s22  ;;  %p133_p13 = scmp.eq.s32.totalorder %s132_s28, 0 }
  0xce   : > { %s732_s2 = sor.u32 %s731_s27, %s132_s28  ;;  %p5592_p6 = por %p746_p12, %p745_p9 }
  0xcf   : > { %p733_p2 = scmp.eq.s32.totalorder %s732_s2, 0  ;;  %s6224_s4 = sadd.s32 4294967294, %s5186_s15  }
  0xd0   : > { %s6223_s30 = scalar_select %p5592_p6, 1, 0 }
  0xd1   : > { %s5597_s21 = scalar_select %p133_p13, %s5166_s1, %s135_s29  }
  0xd2   : > { %s5600_s5 = scalar_select %p733_p2, %s5154_s26, %s735_s13  }
  0xd3   : > { %p752_p0 = scmp.eq.s32.totalorder %s6224_s4, 3  ;;  %p4541_p7 = scmp.lt.s32.totalorder %s5186_s15, 4 }
  0xd4   : > { %s1007_s6 = sand.u32 1, %s5166_s1   ;;  %s4070_s12 = sshll.u32 %s5182_s11, 8 }
  0xd5   : > { %p5607_p5 = por %p752_p0, %p751_p11  ;;  %s3971_s27 = sshll.u32 %s1007_s6, 4 }
  0xd6   : > { %s5612_s28 = scalar_lea.hbm %s6207_s9, %s4070_s12  ;;  %p5616_p8 = pnand %p4541_p7, %p5568_p4 }
  0xd7   : > { %s6225_s14 = scalar_select %p5607_p5, 1, 0 }
  0xd8   : > { %s1011_s4 = scalar_lea.vmem [#allocation2], %s3971_s27  ;;  %s5622_s2 = scalar_lea.sflag [#allocation3], %s1007_s6 }
  0xd9   : > { %s1018_s13 = sshll.u32 %s1011_s4, 4  ;;  %s4962_s20 = scalar_lea.hbm %s5612_s28, 256  ;;  %s5620_s13 = int_to_ptr.vmem [resolvable:$true] %s1018_s13 }
  0xda   : > { %p4963_p1 = scmp.ne.s32.totalorder %s5612_s28, %s4962_s20  ;;  %p4964_p9 = pneg %p5616_p8 }
  0xdb   : > { %s4967_s12 = scalar_lea.hbm %s6207_s9, 512  ;;  %p4968_p13 = scmp.lt.s32.totalorder %s5612_s28, %s6207_s9 }
  0xdc   : > { %p4965_p12 = pnand %p4964_p9, %p4963_p1  ;;  %p4969_p2 = scmp.lt.s32.totalorder %s4967_s12, %s4962_s20 }
  0xde   : > { %p4966_p11 = pneg %p4965_p12  ;;  %p4970_p4 = por %p4969_p2, %p4968_p13 }
  0xe0   : > { %p4971_p0 = pnand %p4970_p4, %p4966_p11 }
  0xe2   : > { %4974 = shalt.err (!%p4971_p0)
}
  0xe3   : > { %s4975_s17 = scalar_lea.vmem %s5620_s13, 256  ;;  %s5230_s6 = smov [#allocation2]  }
  0xe4   : > { %p4976_p7 = scmp.ne.s32.totalorder %s5620_s13, %s4975_s17  ;;  %s4980_s27 = sshll.u32 %s5230_s6, 4  ;;  %s4981_s27 = int_to_ptr.vmem [resolvable:$false] %s4980_s27 }
  0xe5   : > { %s4982_s4 = scalar_lea.vmem %s4981_s27, 512  ;;  %p4983_p10 = scmp.lt.s32.totalorder %s5620_s13, %s4981_s27 }
  0xe6   : > { %p4978_p5 = pnand %p4976_p7, %p4964_p9  ;;  %p4984_p1 = scmp.lt.s32.totalorder %s4982_s4, %s4975_s17 }
  0xe8   : > { %p4979_p6 = pneg %p4978_p5  ;;  %p4985_p12 = por %p4984_p1, %p4983_p10 }
  0xea   : > { %p4986_p3 = pnand %p4985_p12, %p4979_p6 }
  0xec   : > { %4989 = shalt.err (!%p4986_p3)
}
  0xed   : > { %s6227_s20 = smov 8   ;;  %s6228_s12 = smov 128  }
  0xee   : > { %4521 = dma.hbm_to_vmem [thread:$0]  (!%p5616_p8), %s5612_s28, 256, %s5620_s13, %s5622_s2, %s6228_s12, %s6228_s12, %s6227_s20  }
  0xef   : > { %p6229_p5 = scmp.ne.s32.totalorder %s6209_s18, 0 }
  0xf0   : > { %s1040_s6 = sand.u32 (!%p6229_p5), 1, %s5162_s0   ;;  %p6230_p3 = scmp.ne.s32.totalorder (!%p6229_p5), %s6222_s8, 0 }
  0xf1   : > { %1038 = sbr.rel (%p6229_p5) target bundleno = 5804 (0x16ac), region = 136  ;;  %s5645_s27 = sshll.u32 (!%p6229_p5), %s1040_s6, 4 }
  0xf2   : > { %s1041_s17 = scalar_lea.sflag (!%p6229_p5), [#allocation3], %s1040_s6  ;;  %s1044_s4 = scalar_lea.vmem (!%p6229_p5), [#allocation2], %s5645_s27 }
  0xf6   : > { %5113 = dma.done.wait (%p6230_p3), %s1041_s17, 256  }
  0xf7   : > { %5115 = vsyncadd (%p6230_p3), %s1041_s17, 4294967040  ;;  %p6231_p10 = scmp.eq.s32.totalorder %s5463_s16, 0 }
  0xf9   : > { %5117 = dma.done.wait (%p6231_p10), [#allocation6], 1024   ;;  %p6232_p6 = pmov %p6231_p10 }
  0xfb   : > { %5119 = vsyncadd (%p6232_p6), [#allocation6], 4294966272  ;;  %p6233_p8 = pmov %p6232_p6 }
  0xfc   : > { %p6234_p9 = pmov %p6232_p6 }
  0xfd   : > { %5121 = dma.done.wait (%p6233_p8), [#allocation9], 1024  }
  0xfe   : > { %5123 = vsyncadd (%p6234_p9), [#allocation9], 4294966272  ;;  %p6235_p11 = pmov %p6232_p6 }
  0xff   : > { %p6236_p13 = pmov %p6232_p6 }
 0x100   : > { %5125 = dma.done.wait (%p6235_p11), [#allocation12], 1024  }
 0x101   : > { %5127 = vsyncadd (%p6236_p13), [#allocation12], 4294966272  ;;  %p6237_p2 = pmov %p6232_p6 }
 0x103   : > { %5129 = dma.done.wait (%p6237_p2), [#allocation15], 1024   ;;  %p6238_p4 = pmov %p6237_p2 }
 0x104   : > { %p6239_p0 = pmov %p6237_p2 }
 0x105   : > { %5131 = vsyncadd (%p6238_p4), [#allocation15], 4294966272 }
 0x106   : > { %5133 = dma.done.wait (%p6239_p0), [#allocation18], 512   ;;  %p6240_p7 = pmov %p6239_p0 }
 0x107   : > { %s6241_s18 = sld [smem:[#allocation62_spill]]  ;;  %p1182_p1 = scmp.lt.s32.totalorder %s5174_s7, 1  ;;  %v5231_v0 = vmov 0.0   ;;  %vm5232_vm0 = vmmov 0   ;;  %v1209_v1 = vld [vmem:[#allocation7 + $0x18] sm:$0xff]  ;;  %v1208_v2 = vld [vmem:[#allocation7 + $0x10] sm:$0xff] }
 0x108   : > { %5135 = vsyncadd (%p6240_p7), [#allocation18], 4294966784  ;;  %4187 = vmatprep.subr.mxu0 %v5231_v0  ;;  %4195 = vmatprep.mubr.msk.f32.mxu0 %vm5232_vm0, %v5231_v0  ;;  %s6242_s2 = sld [smem:[#allocation31_spill]]  ;;  %v1204_v3 = vld [vmem:[#allocation5 + $0x18] sm:$0xff]  ;;  %v1196_v4 = vld [vmem:[%s1044_s4] sm:$0xff]  ;;  %vm1227_vm1 = vcmask 261120  }
 0x109   : > { %s5678_s8 = scalar_select %p1182_p1, %s5174_s7, 1  ;;  %4198 = vmatprep.subr.mxu1 %v1209_v1  ;;  %v1207_v5 = vld [vmem:[#allocation7 + $0x8] sm:$0xff]  ;;  %4188 = vmatpush3.msra.mxu0 %v1204_v3  ;;  %v1203_v6 = vld [vmem:[#allocation5 + $0x10] sm:$0xff]  ;;  %v1206_v7 = vld [vmem:[#allocation7] sm:$0xff]  ;;  %vm1469_vm2 = vcmask 64512   ;;  %vm1549_vm3 = vcmask 130048  }
 0x10a   : > { %4199 = vmatpush3.msra.mxu1 %v1209_v1  ;;  %4189 = vmatprep.subr.mxu0 %v5231_v0  ;;  %v1202_v8 = vld [vmem:[#allocation5 + $0x8] sm:$0xff]  ;;  %v1201_v10 = vld [vmem:[#allocation5] sm:$0xff]  ;;  %s6243_s6 = sld [smem:[#allocation36_spill]]  ;;  %v1214_v12 = vld [vmem:[#allocation8 + $0x18] sm:$0xff]  ;;  %vm2170_vm4 = vcmask 195584   ;;  %vm3498_vm5 = vcmask 523264  }
 0x10b   : > { %s3988_s29 = sshll.u32 %s5678_s8, 1  ;;  %4200 = vmatprep.subr.mxu1 %v1208_v2  ;;  %4206 = vmatprep.mubr.msk.f32.mxu1 %vm1227_vm1, %v1196_v4  ;;  %v1197_v9 = vld [vmem:[%s1044_s4 + $0x8] sm:$0xff]  ;;  %s6244_s27 = sld [smem:[#allocation35_spill]]  ;;  %v1213_v13 = vld [vmem:[#allocation8 + $0x10] sm:$0xff]  ;;  %v1211_v15 = vld [vmem:[#allocation8] sm:$0xff] }
 0x10c   : > { %4201 = vmatpush3.msra.mxu1 %v1208_v2  ;;  %4190 = vmatpush3.msra.mxu0 %v1203_v6  ;;  %v1212_v14 = vld [vmem:[#allocation8 + $0x8] sm:$0xff]  ;;  %s6245_s17 = sld [smem:[#allocation38_spill]]  ;;  %s5233_s4 = smov 120  }
 0x10d   : > { %p1184_p12 = scmp.lt.s32.totalorder %s6241_s18, 1  ;;  %4202 = vmatprep.subr.mxu1 %v1207_v5  ;;  %4191 = vmatprep.subr.mxu0 %v5231_v0  ;;  %p6262_p3 = scmp.ne.s32.totalorder %s6223_s30, 0 }
 0x10e   : > { %4203 = vmatpush3.msra.mxu1 %v1207_v5  ;;  %4192 = vmatpush3.msra.mxu0 %v1202_v8 }
 0x10f   : > { %s1185_s28 = scalar_select %p1184_p12, %s6241_s18, 1  ;;  %4204 = vmatprep.subr.mxu1 %v1206_v7  ;;  %4193 = vmatprep.subr.mxu0 %v5231_v0 }
 0x110   : > { %4205 = vmatpush3.msra.mxu1 %v1206_v7  ;;  %4194 = vmatpush3.msra.mxu0 %v1201_v10  ;;  %v3993_v16 = vld [vmem:[%s6243_s6] ss:$0 sm:$0xff]  ;;  %s5237_s6 = smov 16  }
 0x111   : > { %s1187_s13 = sadd.s32 %s3988_s29, %s1185_s28  ;;  %4207 = vmatmul.mubr.msk.f32.vlgmr.msra.gmra.mxu1 %vm1227_vm1, %v1197_v9  ;;  %4220 = vmatprep.subr.mxu1 %v5231_v0  ;;  %v3991_v17 = vld [vmem:[%s6244_s27] ss:$0 sm:$0xff]  ;;  %s5234_s28 = smov 112  }
 0x112   : > { %s3989_s20 = sshll.u32 %s1187_s13, 3  ;;  %4224 = vmatprep.mubr.msk.f32.mxu1 %vm5232_vm0, %v5231_v0  ;;  %4209 = vmatprep.subr.mxu0 %v1214_v12  ;;  %v3996_v26 = vld [vmem:[%s6245_s17] ss:$0 sm:$0xff]  ;;  %s5235_s29 = smov 104  }
 0x113   : > { %s1189_s12 = scalar_lea.vmem %s6242_s2, %s3989_s20  ;;  %s5236_s13 = smov 8  }
 0x114   : > { %v5690_v11 = vld [vmem:[%s1189_s12] sm:$0xff]  ;;  %s6170_s2 = sand.u32 1, %s5150_s23   ;;  %s6246_s27 = sld [smem:[#allocation40_spill]] }
 0x115   : > { %4196 = vmatmul.mubr.msk.f32.vlgmr.msra.gmra.mxu0 %vm1227_vm1, %v5690_v11  ;;  %s5795_s20 = sshll.u32 %s6170_s2, 3  ;;  %s6172_s17 = smov 24  }
 0x116   : > { %4217 = vmatprep.mubr.msk.f32.mxu0 %vm1227_vm1, %v1196_v4  ;;  %4210 = vmatpush3.msra.mxu0 %v1214_v12  ;;  %s6171_s12 = scalar_lea.vmem [#allocation20], %s5795_s20  ;;  %s6247_s2 = sld [smem:[#allocation33_spill]] }
 0x117   : > { %4211 = vmatprep.subr.mxu0 %v1213_v13 }
 0x118   : > { %4212 = vmatpush3.msra.mxu0 %v1213_v13 }
 0x119   : > { %4213 = vmatprep.subr.mxu0 %v1212_v14 }
 0x11a   : > { %4214 = vmatpush3.msra.mxu0 %v1212_v14 }
 0x11b   : > { %4215 = vmatprep.subr.mxu0 %v1211_v15 }
 0x11c   : > { %4216 = vmatpush3.msra.mxu0 %v1211_v15 }
 0x11d   : > { %4218 = vmatmul.mubr.msk.f32.vlgmr.msra.gmra.mxu0 %vm1227_vm1, %v1197_v9  ;;  %4227 = vmatprep.subr.mxu0 %v5231_v0 }
 0x11e   : > { %4231 = vmatprep.mubr.msk.f32.mxu0 %vm5232_vm0, %v5231_v0 }
 0x1d1   : > { %v4208_v18 = vpop.f32.mrf.mxu1 }
 0x1d2   : > { %v1385_v19 = vadd.f32 %v4208_v18, %v3993_v16 }
 0x1d3   : > { %v1379_v21 = vpop.f32.mrf.mxu1 }
 0x1d4   : > { %1639 = vrot.lane.b32.xlu0 %v1385_v19, %s5233_s4  ;;  %4221 = vmatpush3.xpose.msk.msra.mxu1 %vm1469_vm2, %v1385_v19  ;;  %v1380_v24 = vadd.f32 %v3993_v16, %v1379_v21 }
 0x1d5   : > { %v1297_v20 = vpop.f32.mrf.mxu0  ;;  %4222 = vmatprep.subr.mxu1 %v5231_v0 }
 0x1d6   : > { %v1298_v22 = vadd.f32 %v3991_v17, %v1297_v20 }
 0x1d7   : > { %v4197_v23 = vpop.f32.mrf.mxu0 }
 0x1d8   : > { %1635 = vrot.lane.b32.xlu1 %v1298_v22, %s5233_s4  ;;  %1637 = vrot.lane.b32.xlu0 %v1380_v24, %s5233_s4 }
 0x1d9   : > { %4223 = vmatpush3.xpose.msk.msra.mxu1 %vm1469_vm2, %v1380_v24 }
 0x1da   : > { %4234 = vmatprep.subr.mxu1 %v5231_v0 }
 0x1dc   : > { %4225 = vmatmul.mubr.msk.f32.vlgmr.msra.gmra.mxu1 %vm1469_vm2, %v1298_v22 }
 0x1dd   : > { %4238 = vmatprep.mubr.msk.f32.mxu1 %vm5232_vm0, %v5231_v0  ;;  %v4219_v25 = vpop.f32.mrf.mxu0 }
 0x1de   : > { %v5717_v27 = vadd.f32 %v4219_v25, %v3996_v26 }
 0x1df   : > { %v1460_v28 = vpop.f32.mrf.mxu0 }
 0x1e0   : > { %v5719_v29 = vadd.f32 %v3996_v26, %v1460_v28  ;;  %4228 = vmatpush3.msra.mxu0 %v5717_v27 }
 0x1e1   : > { %4229 = vmatprep.subr.mxu0 %v5231_v0 }
 0x1e2   : > { %4230 = vmatpush3.msra.mxu0 %v5719_v29 }
 0x1e3   : > { %4241 = vmatprep.subr.mxu0 %v5231_v0 }
 0x246   : > { %v1640_v30 = vpop.permute.xlu0 %1639 }
 0x247   : > { %4235 = vmatpush3.xpose.msk.msra.mxu1 %vm1469_vm2, %v1640_v30 }
 0x248   : > { %4236 = vmatprep.subr.mxu1 %v5231_v0 }
 0x24a   : > { %v1638_v31 = vpop.permute.xlu0 %1637  ;;  %v1636_v32 = vpop.permute.xlu1 %1635 }
 0x24b   : > { %4237 = vmatpush3.xpose.msk.msra.mxu1 %vm1469_vm2, %v1638_v31 }
 0x24c   : > { %4262 = vmatprep.subr.mxu1 %v5231_v0 }
 0x24e   : > { %4239 = vmatmul.mubr.msk.f32.vlgmr.msra.gmra.mxu1 %vm1469_vm2, %v1636_v32 }
 0x24f   : > { %4266 = vmatprep.mubr.msk.f32.mxu1 %vm5232_vm0, %v5231_v0 }
 0x29c   : > { %v1545_v33 = vpop.f32.mrf.mxu1 }
 0x29d   : > { %v1550_v34 = vsel %vm1549_vm3, %v1545_v33, -inf }
 0x29e   : > { %1551 = vmax.xlane.f32.xlu1 %v1550_v34  ;;  %v4226_v35 = vpop.f32.mrf.mxu1 }
 0x2af   : > { %1731 = vrot.lane.b32.xlu1 %v5719_v29, %s5233_s4 }
 0x2b3   : > { %1814 = vrot.lane.b32.xlu1 %v1385_v19, %s5234_s28 }
 0x2b7   : > { %1987 = vrot.lane.b32.xlu1 %v1385_v19, %s5235_s29 }
 0x30e   : > { %v1713_v36 = vpop.f32.mrf.mxu1 }
 0x30f   : > { %v1717_v37 = vsel %vm1549_vm3, %v1713_v36, -inf }
 0x310   : > { %1718 = vmax.xlane.f32.xlu0 %v1717_v37  ;;  %v4240_v38 = vpop.f32.mrf.mxu1  ;;  %v1218_v37 = vld [vmem:[#allocation10 + $0x10] sm:$0xff] }
 0x311   : > { %v1217_v38 = vld [vmem:[#allocation10 + $0x8] sm:$0xff] }
 0x327   : > { %v1552_v39 = vpop.xlane.xlu1 %1551 }
 0x328   : > { %v1553_v40 = vsub.f32 %v1545_v33, %v1552_v39  ;;  %v1216_v39 = vld [vmem:[#allocation10] sm:$0xff] }
 0x32a   : > { %v1554_v41 = vmul.f32 1.442695, %v1553_v40 }
 0x32b   : > { %v1732_v42 = vpop.permute.xlu1 %1731 }
 0x32c   : > { %4690 = vpow2.f32 %v1554_v41 }
 0x32f   : > { %v1815_v43 = vpop.permute.xlu1 %1814 }
 0x333   : > { %v1988_v44 = vpop.permute.xlu1 %1987 }
 0x334   : > { %4263 = vmatpush3.xpose.msk.msra.mxu1 %vm1469_vm2, %v1988_v44 }
 0x335   : > { %4264 = vmatprep.subr.mxu1 %v5231_v0 }
 0x339   : > { %v4691_v45 = vpop.eup %4690 }
 0x33a   : > { %v1556_v46 = vsel %vm1549_vm3, %v4691_v45, 0.0 }
 0x33b   : > { %1557 = vadd.xlane.f32.xlu0 %v1556_v46 }
 0x351   : > { %1733 = vrot.lane.b32.xlu0 %v5717_v27, %s5233_s4 }
 0x355   : > { %1812 = vrot.lane.b32.xlu0 %v1380_v24, %s5234_s28 }
 0x359   : > { %1810 = vrot.lane.b32.xlu0 %v1298_v22, %s5234_s28 }
 0x35d   : > { %1983 = vrot.lane.b32.xlu0 %v1298_v22, %s5235_s29 }
 0x399   : > { %v1719_v47 = vpop.xlane.xlu0 %1718 }
 0x39a   : > { %v1720_v48 = vsub.f32 %v1713_v36, %v1719_v47  ;;  %v1219_v36 = vld [vmem:[#allocation10 + $0x18] sm:$0xff] }
 0x39c   : > { %v1721_v49 = vmul.f32 1.442695, %v1720_v48 }
 0x39e   : > { %4692 = vpow2.f32 %v1721_v49 }
 0x3ab   : > { %v4693_v50 = vpop.eup %4692 }
 0x3ac   : > { %v1723_v51 = vsel %vm1549_vm3, %v4693_v50, 0.0 }
 0x3ad   : > { %1724 = vadd.xlane.f32.xlu1 %v1723_v51 }
 0x3be   : > { %1985 = vrot.lane.b32.xlu1 %v1380_v24, %s5235_s29 }
 0x3c4   : > { %v1558_v52 = vpop.xlane.xlu0 %1557 }
 0x3c5   : > { %4694 = vrcp.f32 %v1558_v52 }
 0x3c8   : > { %v1734_v55 = vpop.permute.xlu0 %1733 }
 0x3cc   : > { %v1813_v56 = vpop.permute.xlu0 %1812 }
 0x3d0   : > { %v1811_v58 = vpop.permute.xlu0 %1810 }
 0x3d2   : > { %v4695_v53 = vpop.eup %4694 }
 0x3d3   : > { %v5748_v54 = vmul.f32 %v4695_v53, %v4691_v45 }
 0x3d4   : > { %v1984_v60 = vpop.permute.xlu0 %1983 }
 0x3d5   : > { %4232 = vmatmul.mubr.msk.f32.vlgmr.msra.gmra.mxu0 %vm1549_vm3, %v5748_v54 }
 0x3d6   : > { %4242 = vmatpush3.msra.mxu0 %v1734_v55  ;;  %4245 = vmatprep.mubr.msk.f32.mxu0 %vm5232_vm0, %v5231_v0 }
 0x3d7   : > { %4243 = vmatprep.subr.mxu0 %v5231_v0 }
 0x3d8   : > { %4244 = vmatpush3.msra.mxu0 %v1732_v42 }
 0x3d9   : > { %4248 = vmatprep.subr.mxu0 %v5231_v0 }
 0x436   : > { %v1725_v57 = vpop.xlane.xlu1 %1724 }
 0x437   : > { %4696 = vrcp.f32 %v1725_v57  ;;  %v2290_v57 = vld [vmem:[#allocation13 + $0x10] sm:$0xff] }
 0x43a   : > { %v1986_v59 = vpop.permute.xlu1 %1985 }
 0x43b   : > { %4265 = vmatpush3.xpose.msk.msra.mxu1 %vm1469_vm2, %v1986_v59  ;;  %v2288_v59 = vld [vmem:[#allocation13] sm:$0xff] }
 0x43c   : > { %4287 = vmatprep.subr.mxu1 %v5231_v0 }
 0x43e   : > { %4267 = vmatmul.mubr.msk.f32.vlgmr.msra.gmra.mxu1 %vm1469_vm2, %v1984_v60 }
 0x43f   : > { %4295 = vmatprep.mubr.msk.f32.mxu1 %vm5232_vm0, %v5231_v0 }
 0x444   : > { %v4697_v61 = vpop.eup %4696 }
 0x445   : > { %v1727_v62 = vmul.f32 %v4697_v61, %v4693_v50  ;;  %v4015_v50 = vld [vmem:[%s6246_s27] ss:$0 sm:$0xff]  ;;  %s6251_s27 = sld [smem:[#allocation42_spill]] }
 0x447   : > { %4246 = vmatmul.mubr.msk.f32.vlgmr.msra.gmra.mxu0 %vm1549_vm3, %v1727_v62  ;;  %v1728_v28 = vadd.f32 %v1727_v62, %v5748_v54 }
 0x448   : > { %4249 = vmatpush3.xpose.msk.msra.mxu0 %vm1469_vm2, %v1815_v43  ;;  %4252 = vmatprep.mubr.msk.f32.mxu0 %vm5232_vm0, %v5231_v0 }
 0x449   : > { %4250 = vmatprep.subr.mxu0 %v5231_v0 }
 0x44c   : > { %4251 = vmatpush3.xpose.msk.msra.mxu0 %vm1469_vm2, %v1813_v56  ;;  %v2291_v56 = vld [vmem:[#allocation13 + $0x18] sm:$0xff] }
 0x44d   : > { %4255 = vmatprep.subr.mxu0 %v5231_v0 }
 0x44f   : > { %4253 = vmatmul.mubr.msk.f32.vlgmr.msra.gmra.mxu0 %vm1469_vm2, %v1811_v58  ;;  %v2289_v58 = vld [vmem:[#allocation13 + $0x8] sm:$0xff] }
 0x450   : > { %4259 = vmatprep.mubr.msk.f32.mxu0 %vm5232_vm0, %v5231_v0 }
 0x495   : > { %v5771_v63 = vpop.f32.mrf.mxu0 }
 0x497   : > { %v4233_v1 = vpop.f32.mrf.mxu0 }
 0x4fe   : > { %v2061_v2 = vpop.f32.mrf.mxu1 }
 0x4ff   : > { %v2065_v3 = vsel %vm1549_vm3, %v2061_v2, -inf }
 0x500   : > { %2066 = vmax.xlane.f32.xlu0 %v2065_v3  ;;  %v4268_v4 = vpop.f32.mrf.mxu1 }
 0x501   : > { %v2286_v4 = vld [vmem:[#allocation11 + $0x18] sm:$0xff] }
 0x502   : > { %4288 = vmatpush3.msra.mxu1 %v2286_v4 }
 0x503   : > { %4289 = vmatprep.subr.mxu1 %v5231_v0 }
 0x507   : > { %v1806_v5 = vpop.f32.mrf.mxu0 }
 0x509   : > { %v4247_v6 = vpop.f32.mrf.mxu0 }
 0x50a   : > { %v2284_v6 = vld [vmem:[#allocation11 + $0x8] sm:$0xff] }
 0x50f   : > { %v1888_v7 = vpop.f32.mrf.mxu0 }
 0x510   : > { %v1892_v8 = vsel %vm1549_vm3, %v1888_v7, -inf }
 0x511   : > { %1893 = vmax.xlane.f32.xlu1 %v1892_v8  ;;  %v4254_v9 = vpop.f32.mrf.mxu0 }
 0x516   : > { %1906 = vrot.lane.b32.xlu0 %v5717_v27, %s5234_s28 }
 0x589   : > { %v2067_v10 = vpop.xlane.xlu0 %2066 }
 0x58a   : > { %v2068_v12 = vsub.f32 %v2061_v2, %v2067_v10 }
 0x58c   : > { %v2069_v13 = vmul.f32 1.442695, %v2068_v12 }
 0x58d   : > { %v1907_v14 = vpop.permute.xlu0 %1906 }
 0x58e   : > { %4698 = vpow2.f32 %v2069_v13  ;;  %4256 = vmatpush3.msra.mxu0 %v1907_v14 }
 0x58f   : > { %4257 = vmatprep.subr.mxu0 %v5231_v0 }
 0x59a   : > { %v1894_v15 = vpop.xlane.xlu1 %1893 }
 0x59b   : > { %v4699_v16 = vpop.eup %4698  ;;  %v1895_v17 = vsub.f32 %v1888_v7, %v1894_v15  ;;  %v2283_v7 = vld [vmem:[#allocation11] sm:$0xff] }
 0x59c   : > { %v2071_v18 = vsel %vm1549_vm3, %v4699_v16, 0.0 }
 0x59d   : > { %v1896_v19 = vmul.f32 1.442695, %v1895_v17  ;;  %2072 = vadd.xlane.f32.xlu1 %v2071_v18 }
 0x59f   : > { %4700 = vpow2.f32 %v1896_v19 }
 0x5ac   : > { %v4701_v20 = vpop.eup %4700 }
 0x5ad   : > { %v1898_v21 = vsel %vm1549_vm3, %v4701_v20, 0.0 }
 0x5ae   : > { %1899 = vadd.xlane.f32.xlu0 %v1898_v21  ;;  %1904 = vrot.lane.b32.xlu1 %v5719_v29, %s5234_s28 }
 0x5b2   : > { %2079 = vrot.lane.b32.xlu1 %v5717_v27, %s5235_s29 }
 0x5b6   : > { %2157 = vrot.lane.b32.xlu1 %v1806_v5, %s5236_s13  ;;  %v2285_v5 = vld [vmem:[#allocation11 + $0x10] sm:$0xff] }
 0x5b7   : > { %4290 = vmatpush3.msra.mxu1 %v2285_v5 }
 0x5b8   : > { %4291 = vmatprep.subr.mxu1 %v5231_v0 }
 0x5b9   : > { %4292 = vmatpush3.msra.mxu1 %v2284_v6 }
 0x5ba   : > { %4293 = vmatprep.subr.mxu1 %v5231_v0 }
 0x5bb   : > { %4294 = vmatpush3.msra.mxu1 %v2283_v7 }
 0x5bc   : > { %4315 = vmatprep.subr.mxu1 %v5231_v0 }
 0x5c4   : > { %2077 = vrot.lane.b32.xlu0 %v5719_v29, %s5235_s29 }
 0x626   : > { %v2073_v22 = vpop.xlane.xlu1 %2072 }
 0x627   : > { %4702 = vrcp.f32 %v2073_v22 }
 0x62a   : > { %v1905_v23 = vpop.permute.xlu1 %1904 }
 0x62b   : > { %4258 = vmatpush3.msra.mxu0 %v1905_v23 }
 0x62c   : > { %4269 = vmatprep.subr.mxu0 %v5231_v0 }
 0x62e   : > { %v2080_v30 = vpop.permute.xlu1 %2079 }
 0x632   : > { %v2158_v44 = vpop.permute.xlu1 %2157 }
 0x633   : > { %v2168_v46 = vsel %vm1469_vm2, %v5771_v63, %v2158_v44 }
 0x634   : > { %v4703_v25 = vpop.eup %4702 }
 0x635   : > { %v2075_v31 = vmul.f32 %v4703_v25, %v4699_v16 }
 0x637   : > { %v1900_v24 = vpop.xlane.xlu0 %1899 }
 0x638   : > { %4704 = vrcp.f32 %v1900_v24 }
 0x63b   : > { %v2078_v32 = vpop.permute.xlu0 %2077 }
 0x645   : > { %v4705_v26 = vpop.eup %4704 }
 0x646   : > { %v1902_v27 = vmul.f32 %v4705_v26, %v4701_v20 }
 0x648   : > { %4260 = vmatmul.mubr.msk.f32.vlgmr.msra.gmra.mxu0 %vm1549_vm3, %v1902_v27  ;;  %v1903_v29 = vadd.f32 %v1902_v27, %v1728_v28  ;;  %v2296_v27 = vld [vmem:[#allocation14 + $0x18] sm:$0xff] }
 0x649   : > { %4270 = vmatpush3.msra.mxu0 %v2080_v30  ;;  %4273 = vmatprep.mubr.msk.f32.mxu0 %vm5232_vm0, %v5231_v0  ;;  %v2295_v30 = vld [vmem:[#allocation14 + $0x10] sm:$0xff] }
 0x64a   : > { %4271 = vmatprep.subr.mxu0 %v5231_v0  ;;  %v2076_v33 = vadd.f32 %v2075_v31, %v1903_v29  ;;  %v2293_v29 = vld [vmem:[#allocation14] sm:$0xff] }
 0x64b   : > { %4272 = vmatpush3.msra.mxu0 %v2078_v32  ;;  %v4019_v32 = vld [vmem:[%s6251_s27] ss:$0 sm:$0xff]  ;;  %s6260_s27 = sld [smem:[#allocation60_spill]] }
 0x64c   : > { %4274 = vmatmul.mubr.msk.f32.vlgmr.msra.gmra.mxu0 %vm1549_vm3, %v2075_v31  ;;  %4276 = vmatprep.subr.mxu0 %v5231_v0  ;;  %v2251_v34 = vmul.f32 0.25, %v2076_v33  ;;  %v2294_v31 = vld [vmem:[#allocation14 + $0x8] sm:$0xff] }
 0x64d   : > { %4284 = vmatprep.mubr.msk.f32.mxu0 %vm5232_vm0, %v5231_v0  ;;  %4277 = vmatpush3.msra.mxu0 %v1219_v36 }
 0x64e   : > { %v3603_v35 = vsel %vm1549_vm3, %v2251_v34, 0.0  ;;  %4278 = vmatprep.subr.mxu0 %v5231_v0 }
 0x64f   : > { %3604 = vst [vmem:[%s6171_s12] sm:$0xff] %v3603_v35  ;;  %4279 = vmatpush3.msra.mxu0 %v1218_v37  ;;  %s4445_s12 = smul.u32 24, %s5678_s8  ;;  %s6248_s8 = sld [smem:[#allocation44_spill]] }
 0x650   : > { %4280 = vmatprep.subr.mxu0 %v5231_v0 }
 0x651   : > { %4281 = vmatpush3.msra.mxu0 %v1217_v38 }
 0x652   : > { %4282 = vmatprep.subr.mxu0 %v5231_v0 }
 0x653   : > { %4283 = vmatpush3.msra.mxu0 %v1216_v39 }
 0x654   : > { %4298 = vmatprep.subr.mxu0 %v5231_v0 }
 0x655   : > { %v4021_v10 = vld [vmem:[%s6248_s8] ss:$0 sm:$0xff]  ;;  %s6257_s8 = sld [smem:[#allocation56_spill]] }
 0x708   : > { %v1979_v40 = vpop.f32.mrf.mxu0 }
 0x709   : > { %2161 = vrot.lane.b32.xlu0 %v1979_v40, %s5237_s6 }
 0x70a   : > { %v4261_v41 = vpop.f32.mrf.mxu0 }
 0x70c   : > { %v2152_v42 = vpop.f32.mrf.mxu0 }
 0x70d   : > { %2165 = vrot.lane.b32.xlu1 %v2152_v42, %s6172_s17  ;;  %s1194_s17 = scalar_lea.vmem %s6247_s2, %s4445_s12  ;;  %s6249_s2 = sld [smem:[#allocation53_spill]] }
 0x70e   : > { %v4275_v43 = vpop.f32.mrf.mxu0  ;;  %v5826_v60 = vld [vmem:[%s1194_s17] sm:$0xff]  ;;  %v5840_v61 = vld [vmem:[%s1194_s17 + $0x10] sm:$0xff]  ;;  %s6250_s12 = sld [smem:[#allocation54_spill]] }
 0x713   : > { %v4017_v23 = vld [vmem:[%s6249_s2] ss:$0 sm:$0xff]  ;;  %s6258_s2 = sld [smem:[#allocation50_spill]] }
 0x714   : > { %v4018_v25 = vld [vmem:[%s6250_s12] ss:$0 sm:$0xff]  ;;  %s6259_s12 = sld [smem:[#allocation52_spill]] }
 0x77b   : > { %v2162_v45 = vpop.permute.xlu0 %2161 }
 0x77c   : > { %v2169_v47 = vsel %vm1549_vm3, %v2168_v46, %v2162_v45 }
 0x77f   : > { %v2166_v48 = vpop.permute.xlu1 %2165 }
 0x780   : > { %v2171_v49 = vsel %vm2170_vm4, %v2169_v47, %v2166_v48 }
 0x781   : > { %4285 = vmatmul.mubr.msk.f32.vlgmr.msra.gmra.mxu0 %vm1227_vm1, %v2171_v49 }
 0x782   : > { %4306 = vmatprep.mubr.msk.f32.mxu0 %vm5232_vm0, %v5231_v0  ;;  %4299 = vmatpush3.msra.mxu0 %v2291_v56 }
 0x783   : > { %4300 = vmatprep.subr.mxu0 %v5231_v0 }
 0x784   : > { %4301 = vmatpush3.msra.mxu0 %v2290_v57 }
 0x785   : > { %4302 = vmatprep.subr.mxu0 %v5231_v0 }
 0x786   : > { %4303 = vmatpush3.msra.mxu0 %v2289_v58 }
 0x787   : > { %4304 = vmatprep.subr.mxu0 %v5231_v0 }
 0x788   : > { %4305 = vmatpush3.msra.mxu0 %v2288_v59 }
 0x789   : > { %4307 = vmatmul.mubr.msk.f32.vlgmr.msra.gmra.mxu0 %vm1227_vm1, %v5826_v60  ;;  %4332 = vmatprep.subr.mxu0 %v5231_v0 }
 0x78a   : > { %4309 = vmatprep.mubr.msk.f32.mxu0 %vm5232_vm0, %v5231_v0 }
 0x841   : > { %v2247_v51 = vpop.f32.mrf.mxu0 }
 0x842   : > { %v2248_v52 = vadd.f32 %v4015_v50, %v2247_v51 }
 0x843   : > { %v4286_v53 = vpop.f32.mrf.mxu0 }
 0x844   : > { %v2252_v54 = vadd.f32 %v2248_v52, %v5690_v11  ;;  %v5834_v11 = vld [vmem:[%s1194_s17 + $0x8] sm:$0xff]  ;;  %s6252_s17 = sld [smem:[#allocation46_spill]] }
 0x845   : > { %4310 = vmatmul.mubr.msk.f32.gmra.mxu0 %vm1227_vm1, %v5834_v11 }
 0x846   : > { %v2255_v55 = vsel %vm1227_vm1, %v2252_v54, 0.0  ;;  %4312 = vmatprep.mubr.msk.f32.mxu0 %vm5232_vm0, %v5231_v0 }
 0x847   : > { %2256 = vadd.xlane.f32.xlu0 %v2255_v55 }
 0x849   : > { %4313 = vmatmul.mubr.msk.f32.gmra.mxu0 %vm1227_vm1, %v5840_v61  ;;  %v2463_v8 = vpop.f32.mrf.mxu0 }
 0x84a   : > { %4338 = vmatprep.mubr.msk.f32.mxu0 %vm5232_vm0, %v5231_v0  ;;  %v5858_v18 = vadd.f32 %v4021_v10, %v2463_v8  ;;  %v4025_v45 = vld [vmem:[%s6252_s17] ss:$0 sm:$0xff]  ;;  %s3612_s17 = sand.u32 1, %s5463_s16  }
 0x84b   : > { %v4308_v9 = vpop.f32.mrf.mxu0 }
 0x8d0   : > { %v2257_v62 = vpop.xlane.xlu0 %2256 }
 0x8d1   : > { %v2259_v63 = vmul.f32 0.03125, %v2257_v62 }
 0x8d3   : > { %v2260_v1 = vsub.f32 %v2252_v54, %v2259_v63 }
 0x8d5   : > { %v2261_v2 = vmul.f32 %v2260_v1, %v2260_v1 }
 0x8d7   : > { %v2262_v3 = vsel %vm1227_vm1, %v2261_v2, 0.0 }
 0x8d8   : > { %2263 = vadd.xlane.f32.xlu1 %v2262_v3 }
 0x905   : > { %v2468_v12 = vpop.f32.mrf.mxu0 }
 0x906   : > { %v5852_v13 = vadd.f32 %v4021_v10, %v2468_v12 }
 0x907   : > { %v4311_v14 = vpop.f32.mrf.mxu0 }
 0x908   : > { %2734 = vrot.lane.b32.xlu1 %v5852_v13, %s5233_s4 }
 0x909   : > { %v2473_v15 = vpop.f32.mrf.mxu0 }
 0x90a   : > { %v5856_v16 = vadd.f32 %v4021_v10, %v2473_v15 }
 0x90b   : > { %v4314_v17 = vpop.f32.mrf.mxu0 }
 0x90c   : > { %2736 = vrot.lane.b32.xlu0 %v5856_v16, %s5233_s4  ;;  %4333 = vmatpush3.xpose.msk.msra.mxu0 %vm1469_vm2, %v5856_v16 }
 0x90d   : > { %4334 = vmatprep.subr.mxu0 %v5231_v0 }
 0x910   : > { %4335 = vmatpush3.xpose.msk.msra.mxu0 %vm1469_vm2, %v5852_v13  ;;  %2732 = vrot.lane.b32.xlu0 %v5858_v18, %s5233_s4 }
 0x911   : > { %4336 = vmatprep.subr.mxu0 %v5231_v0 }
 0x914   : > { %4337 = vmatpush3.xpose.msk.msra.mxu0 %vm1469_vm2, %v5858_v18 }
 0x915   : > { %4350 = vmatprep.subr.mxu0 %v5231_v0 }
 0x961   : > { %v2264_v19 = vpop.xlane.xlu1 %2263 }
 0x962   : > { %v2265_v20 = vmul.f32 0.03125, %v2264_v19 }
 0x964   : > { %v2266_v21 = vadd.f32 1e-06, %v2265_v20 }
 0x966   : > { %4706 = vrsqrt.f32 %v2266_v21 }
 0x973   : > { %v4707_v22 = vpop.eup %4706 }
 0x974   : > { %v2268_v24 = vmul.f32 %v4707_v22, %v2260_v1 }
 0x976   : > { %v2275_v26 = vmul.f32 %v4017_v23, %v2268_v24 }
 0x978   : > { %v5875_v28 = vadd.f32 %v4018_v25, %v2275_v26 }
 0x97a   : > { %4296 = vmatmul.mubr.msk.f32.vlgmr.msra.gmra.mxu1 %vm1227_vm1, %v5875_v28  ;;  %v2735_v37 = vpop.permute.xlu1 %2734 }
 0x97b   : > { %4323 = vmatprep.mubr.msk.f32.mxu1 %vm5232_vm0, %v5231_v0  ;;  %4316 = vmatpush3.msra.mxu1 %v2296_v27 }
 0x97c   : > { %4317 = vmatprep.subr.mxu1 %v5231_v0 }
 0x97d   : > { %4318 = vmatpush3.msra.mxu1 %v2295_v30 }
 0x97e   : > { %4319 = vmatprep.subr.mxu1 %v5231_v0  ;;  %v2737_v35 = vpop.permute.xlu0 %2736 }
 0x97f   : > { %4320 = vmatpush3.msra.mxu1 %v2294_v31 }
 0x980   : > { %4321 = vmatprep.subr.mxu1 %v5231_v0 }
 0x981   : > { %4322 = vmatpush3.msra.mxu1 %v2293_v29 }
 0x982   : > { %4324 = vmatmul.mubr.msk.f32.vlgmr.msra.gmra.mxu1 %vm1227_vm1, %v5826_v60  ;;  %4341 = vmatprep.subr.mxu1 %v5231_v0  ;;  %v2733_v38 = vpop.permute.xlu0 %2732 }
 0x983   : > { %4326 = vmatprep.mubr.msk.f32.mxu1 %vm5232_vm0, %v5231_v0 }
 0x986   : > { %4327 = vmatmul.mubr.msk.f32.gmra.mxu1 %vm1227_vm1, %v5834_v11 }
 0x987   : > { %4329 = vmatprep.mubr.msk.f32.mxu1 %vm5232_vm0, %v5231_v0 }
 0x98a   : > { %4330 = vmatmul.mubr.msk.f32.gmra.mxu1 %vm1227_vm1, %v5840_v61 }
 0x98b   : > { %4347 = vmatprep.mubr.msk.f32.mxu1 %vm5232_vm0, %v5231_v0 }
 0xa3a   : > { %v2378_v33 = vpop.f32.mrf.mxu1 }
 0xa3b   : > { %v5890_v34 = vadd.f32 %v4019_v32, %v2378_v33 }
 0xa3c   : > { %v4297_v36 = vpop.f32.mrf.mxu1 }
 0xa3d   : > { %2730 = vrot.lane.b32.xlu1 %v5890_v34, %s5233_s4  ;;  %4339 = vmatmul.mubr.msk.f32.vlgmr.msra.gmra.mxu0 %vm1469_vm2, %v5890_v34 }
 0xa3e   : > { %4351 = vmatpush3.xpose.msk.msra.mxu0 %vm1469_vm2, %v2737_v35  ;;  %4356 = vmatprep.mubr.msk.f32.mxu0 %vm5232_vm0, %v5231_v0 }
 0xa3f   : > { %4352 = vmatprep.subr.mxu0 %v5231_v0 }
 0xa42   : > { %4353 = vmatpush3.xpose.msk.msra.mxu0 %vm1469_vm2, %v2735_v37  ;;  %v2549_v40 = vpop.f32.mrf.mxu1 }
 0xa43   : > { %4354 = vmatprep.subr.mxu0 %v5231_v0  ;;  %v5923_v52 = vadd.f32 %v4025_v45, %v2549_v40 }
 0xa44   : > { %v4325_v41 = vpop.f32.mrf.mxu1 }
 0xa46   : > { %4355 = vmatpush3.xpose.msk.msra.mxu0 %vm1469_vm2, %v2733_v38  ;;  %v2554_v42 = vpop.f32.mrf.mxu1 }
 0xa47   : > { %4377 = vmatprep.subr.mxu0 %v5231_v0  ;;  %v5917_v49 = vadd.f32 %v4025_v45, %v2554_v42 }
 0xa48   : > { %v4328_v46 = vpop.f32.mrf.mxu1 }
 0xa4a   : > { %v2559_v48 = vpop.f32.mrf.mxu1 }
 0xa4b   : > { %v5919_v50 = vadd.f32 %v4025_v45, %v2559_v48 }
 0xa4c   : > { %v4331_v51 = vpop.f32.mrf.mxu1 }
 0xa4d   : > { %4342 = vmatpush3.msra.mxu1 %v5919_v50 }
 0xa4e   : > { %4343 = vmatprep.subr.mxu1 %v5231_v0 }
 0xa4f   : > { %4344 = vmatpush3.msra.mxu1 %v5917_v49 }
 0xa50   : > { %4345 = vmatprep.subr.mxu1 %v5231_v0 }
 0xa51   : > { %4346 = vmatpush3.msra.mxu1 %v5923_v52 }
 0xa52   : > { %4359 = vmatprep.subr.mxu1 %v5231_v0 }
 0xaaf   : > { %v2731_v39 = vpop.permute.xlu1 %2730 }
 0xab0   : > { %4357 = vmatmul.mubr.msk.f32.vlgmr.msra.gmra.mxu0 %vm1469_vm2, %v2731_v39 }
 0xab1   : > { %4383 = vmatprep.mubr.msk.f32.mxu0 %vm5232_vm0, %v5231_v0 }
 0xafd   : > { %v2641_v43 = vpop.f32.mrf.mxu0 }
 0xafe   : > { %v2645_v44 = vsel %vm2170_vm4, %v2641_v43, -inf }
 0xaff   : > { %2646 = vmax.xlane.f32.xlu0 %v2645_v44  ;;  %v4340_v47 = vpop.f32.mrf.mxu0 }
 0xb70   : > { %v2812_v53 = vpop.f32.mrf.mxu0 }
 0xb71   : > { %v2816_v54 = vsel %vm2170_vm4, %v2812_v53, -inf }
 0xb72   : > { %2817 = vmax.xlane.f32.xlu1 %v2816_v54  ;;  %v4358_v55 = vpop.f32.mrf.mxu0 }
 0xb83   : > { %2835 = vrot.lane.b32.xlu1 %v5919_v50, %s5233_s4 }
 0xb87   : > { %2831 = vrot.lane.b32.xlu1 %v5923_v52, %s5233_s4 }
 0xb88   : > { %v2647_v56 = vpop.xlane.xlu0 %2646 }
 0xb89   : > { %v2648_v57 = vsub.f32 %v2641_v43, %v2647_v56 }
 0xb8b   : > { %v2649_v58 = vmul.f32 1.442695, %v2648_v57  ;;  %2919 = vrot.lane.b32.xlu1 %v5856_v16, %s5234_s28 }
 0xb8d   : > { %4708 = vpow2.f32 %v2649_v58 }
 0xb8f   : > { %2915 = vrot.lane.b32.xlu1 %v5858_v18, %s5234_s28 }
 0xb9a   : > { %v4709_v59 = vpop.eup %4708 }
 0xb9b   : > { %v2651_v60 = vsel %vm2170_vm4, %v4709_v59, 0.0 }
 0xb9c   : > { %2652 = vadd.xlane.f32.xlu0 %v2651_v60  ;;  %v2301_v60 = vld [vmem:[#allocation16 + $0x18] sm:$0xff] }
 0xbfb   : > { %v2818_v11 = vpop.xlane.xlu1 %2817 }
 0xbfc   : > { %v2819_v61 = vsub.f32 %v2812_v53, %v2818_v11  ;;  %v2300_v11 = vld [vmem:[#allocation16 + $0x10] sm:$0xff] }
 0xbfe   : > { %v2820_v62 = vmul.f32 1.442695, %v2819_v61  ;;  %v2299_v61 = vld [vmem:[#allocation16 + $0x8] sm:$0xff] }
 0xbff   : > { %v2836_v5 = vpop.permute.xlu1 %2835 }
 0xc00   : > { %4710 = vpow2.f32 %v2820_v62  ;;  %v2298_v62 = vld [vmem:[#allocation16] sm:$0xff] }
 0xc03   : > { %v2832_v8 = vpop.permute.xlu1 %2831 }
 0xc07   : > { %v2920_v17 = vpop.permute.xlu1 %2919 }
 0xc0b   : > { %v2916_v19 = vpop.permute.xlu1 %2915 }
 0xc0d   : > { %v4711_v63 = vpop.eup %4710 }
 0xc0e   : > { %v2822_v1 = vsel %vm2170_vm4, %v4711_v63, 0.0 }
 0xc0f   : > { %2823 = vadd.xlane.f32.xlu0 %v2822_v1 }
 0xc25   : > { %v2653_v2 = vpop.xlane.xlu0 %2652  ;;  %2833 = vrot.lane.b32.xlu0 %v5917_v49, %s5233_s4  ;;  %s6173_s4 = scalar_lea.vmem [#allocation22], %s5795_s20 }
 0xc26   : > { %4712 = vrcp.f32 %v2653_v2 }
 0xc29   : > { %2917 = vrot.lane.b32.xlu0 %v5852_v13, %s5234_s28 }
 0xc2d   : > { %2913 = vrot.lane.b32.xlu0 %v5890_v34, %s5234_s28 }
 0xc31   : > { %3015 = vrot.lane.b32.xlu0 %v5919_v50, %s5234_s28 }
 0xc33   : > { %v4713_v3 = vpop.eup %4712 }
 0xc34   : > { %v5948_v4 = vmul.f32 %v4713_v3, %v4709_v59 }
 0xc36   : > { %4348 = vmatmul.mubr.msk.f32.vlgmr.msra.gmra.mxu1 %vm2170_vm4, %v5948_v4 }
 0xc37   : > { %4360 = vmatpush3.msra.mxu1 %v2836_v5  ;;  %4365 = vmatprep.mubr.msk.f32.mxu1 %vm5232_vm0, %v5231_v0 }
 0xc38   : > { %4361 = vmatprep.subr.mxu1 %v5231_v0 }
 0xc98   : > { %v2824_v6 = vpop.xlane.xlu0 %2823 }
 0xc99   : > { %4714 = vrcp.f32 %v2824_v6 }
 0xc9c   : > { %v2834_v7 = vpop.permute.xlu0 %2833 }
 0xc9d   : > { %4362 = vmatpush3.msra.mxu1 %v2834_v7 }
 0xc9e   : > { %4363 = vmatprep.subr.mxu1 %v5231_v0 }
 0xc9f   : > { %4364 = vmatpush3.msra.mxu1 %v2832_v8 }
 0xca0   : > { %v2918_v9 = vpop.permute.xlu0 %2917  ;;  %4368 = vmatprep.subr.mxu1 %v5231_v0 }
 0xca4   : > { %v2914_v10 = vpop.permute.xlu0 %2913 }
 0xca6   : > { %v4715_v12 = vpop.eup %4714 }
 0xca7   : > { %v2826_v14 = vmul.f32 %v4715_v12, %v4711_v63 }
 0xca8   : > { %v3016_v15 = vpop.permute.xlu0 %3015 }
 0xca9   : > { %4366 = vmatmul.mubr.msk.f32.vlgmr.msra.gmra.mxu1 %vm2170_vm4, %v2826_v14  ;;  %4378 = vmatpush3.msra.mxu0 %v3016_v15  ;;  %v2827_v36 = vadd.f32 %v2826_v14, %v5948_v4 }
 0xcaa   : > { %4369 = vmatpush3.xpose.msk.msra.mxu1 %vm1469_vm2, %v2920_v17  ;;  %4374 = vmatprep.mubr.msk.f32.mxu1 %vm5232_vm0, %v5231_v0 }
 0xcab   : > { %4370 = vmatprep.subr.mxu1 %v5231_v0  ;;  %4379 = vmatprep.subr.mxu0 %v5231_v0 }
 0xcae   : > { %4371 = vmatpush3.xpose.msk.msra.mxu1 %vm1469_vm2, %v2918_v9 }
 0xcaf   : > { %4372 = vmatprep.subr.mxu1 %v5231_v0 }
 0xcb2   : > { %4373 = vmatpush3.xpose.msk.msra.mxu1 %vm1469_vm2, %v2916_v19 }
 0xcb3   : > { %4395 = vmatprep.subr.mxu1 %v5231_v0 }
 0xcb5   : > { %4375 = vmatmul.mubr.msk.f32.vlgmr.msra.gmra.mxu1 %vm1469_vm2, %v2914_v10 }
 0xcb6   : > { %4401 = vmatprep.mubr.msk.f32.mxu1 %vm5232_vm0, %v5231_v0 }
 0xcf6   : > { %v5970_v20 = vpop.f32.mrf.mxu1 }
 0xcf8   : > { %v4349_v21 = vpop.f32.mrf.mxu1 }
 0xd69   : > { %v5972_v22 = vpop.f32.mrf.mxu1 }
 0xd6b   : > { %v4367_v23 = vpop.f32.mrf.mxu1 }
 0xd6c   : > { %v3401_v23 = vld [vmem:[#allocation17 + $0x18] sm:$0xff] }
 0xd75   : > { %v2995_v24 = vpop.f32.mrf.mxu1 }
 0xd76   : > { %v2999_v25 = vsel %vm2170_vm4, %v2995_v24, -inf }
 0xd77   : > { %3000 = vmax.xlane.f32.xlu1 %v2999_v25  ;;  %v4376_v26 = vpop.f32.mrf.mxu1  ;;  %v3398_v25 = vld [vmem:[#allocation17] sm:$0xff] }
 0xd88   : > { %3013 = vrot.lane.b32.xlu1 %v5917_v49, %s5234_s28 }
 0xd8c   : > { %3011 = vrot.lane.b32.xlu1 %v5923_v52, %s5234_s28  ;;  %s6253_s28 = sld [smem:[#allocation48_spill]] }
 0xd90   : > { %3097 = vrot.lane.b32.xlu1 %v5852_v13, %s5235_s29 }
 0xd92   : > { %v4049_v8 = vld [vmem:[%s6253_s28] ss:$0 sm:$0xff]  ;;  %s4062_s28 = sshll.u32 %s5174_s7, 1 }
 0xd94   : > { %3093 = vrot.lane.b32.xlu1 %v5890_v34, %s5235_s29 }
 0xe00   : > { %v3001_v27 = vpop.xlane.xlu1 %3000 }
 0xe01   : > { %v3002_v30 = vsub.f32 %v2995_v24, %v3001_v27  ;;  %v3400_v24 = vld [vmem:[#allocation17 + $0x10] sm:$0xff] }
 0xe03   : > { %v3003_v31 = vmul.f32 1.442695, %v3002_v30 }
 0xe04   : > { %v3014_v29 = vpop.permute.xlu1 %3013 }
 0xe05   : > { %4716 = vpow2.f32 %v3003_v31  ;;  %4380 = vmatpush3.msra.mxu0 %v3014_v29 }
 0xe06   : > { %4381 = vmatprep.subr.mxu0 %v5231_v0 }
 0xe08   : > { %v3012_v32 = vpop.permute.xlu1 %3011 }
 0xe09   : > { %4382 = vmatpush3.msra.mxu0 %v3012_v32 }
 0xe0a   : > { %4386 = vmatprep.subr.mxu0 %v5231_v0 }
 0xe12   : > { %v4717_v33 = vpop.eup %4716 }
 0xe13   : > { %v3005_v35 = vsel %vm2170_vm4, %v4717_v33, 0.0 }
 0xe14   : > { %3006 = vadd.xlane.f32.xlu0 %v3005_v35 }
 0xe2a   : > { %3099 = vrot.lane.b32.xlu0 %v5856_v16, %s5235_s29  ;;  %v3098_v16 = vpop.permute.xlu1 %3097 }
 0xe2e   : > { %3095 = vrot.lane.b32.xlu0 %v5858_v18, %s5235_s29  ;;  %v3094_v40 = vpop.permute.xlu1 %3093 }
 0xe9d   : > { %v3007_v13 = vpop.xlane.xlu0 %3006 }
 0xe9e   : > { %4718 = vrcp.f32 %v3007_v13 }
 0xea1   : > { %v3100_v38 = vpop.permute.xlu0 %3099 }
 0xea5   : > { %v3096_v18 = vpop.permute.xlu0 %3095 }
 0xeab   : > { %v4719_v34 = vpop.eup %4718 }
 0xeac   : > { %v3009_v37 = vmul.f32 %v4719_v34, %v4717_v33 }
 0xeae   : > { %v3010_v39 = vadd.f32 %v3009_v37, %v2827_v36  ;;  %4384 = vmatmul.mubr.msk.f32.vlgmr.msra.gmra.mxu0 %vm2170_vm4, %v3009_v37  ;;  %v4052_v37 = vld [vmem:[%s6257_s8] ss:$0 sm:$0xff]  ;;  %s6261_s8 = scalar_lea.vmem [#allocation20], %s5795_s20 }
 0xeaf   : > { %4387 = vmatpush3.xpose.msk.msra.mxu0 %vm1469_vm2, %v3100_v38  ;;  %4392 = vmatprep.mubr.msk.f32.mxu0 %vm5232_vm0, %v5231_v0 }
 0xeb0   : > { %4388 = vmatprep.subr.mxu0 %v5231_v0 }
 0xeb3   : > { %4389 = vmatpush3.xpose.msk.msra.mxu0 %vm1469_vm2, %v3098_v16 }
 0xeb4   : > { %4390 = vmatprep.subr.mxu0 %v5231_v0 }
 0xeb7   : > { %4391 = vmatpush3.xpose.msk.msra.mxu0 %vm1469_vm2, %v3096_v18 }
 0xeb8   : > { %4415 = vmatprep.subr.mxu0 %v5231_v0 }
 0xeba   : > { %4393 = vmatmul.mubr.msk.f32.vlgmr.msra.gmra.mxu0 %vm1469_vm2, %v3094_v40 }
 0xebb   : > { %4423 = vmatprep.mubr.msk.f32.mxu0 %vm5232_vm0, %v5231_v0  ;;  %4416 = vmatpush3.msra.mxu0 %v3401_v23 }
 0xebc   : > { %4417 = vmatprep.subr.mxu0 %v5231_v0 }
 0xebd   : > { %4418 = vmatpush3.msra.mxu0 %v3400_v24 }
 0xebe   : > { %4419 = vmatprep.subr.mxu0 %v5231_v0 }
 0xf6e   : > { %v3089_v41 = vpop.f32.mrf.mxu0 }
 0xf70   : > { %v4385_v42 = vpop.f32.mrf.mxu0 }
 0xf7a   : > { %v3175_v43 = vpop.f32.mrf.mxu0 }
 0xf7b   : > { %v3179_v44 = vsel %vm2170_vm4, %v3175_v43, -inf }
 0xf7c   : > { %3180 = vmax.xlane.f32.xlu0 %v3179_v44  ;;  %v4394_v45 = vpop.f32.mrf.mxu0 }
 0xf92   : > { %3195 = vrot.lane.b32.xlu0 %v5919_v50, %s5235_s29 }
 0xf96   : > { %3191 = vrot.lane.b32.xlu0 %v5923_v52, %s5235_s29 }
 0xf9a   : > { %3278 = vrot.lane.b32.xlu0 %v3089_v41, %s5237_s6  ;;  %s6256_s6 = sld [smem:[#allocation55_spill]]  ;;  %v4053_v41 = vld [vmem:[%s6258_s2] ss:$0 sm:$0xff]  ;;  %s3648_s2 = sshll.u32 %s6261_s8, 4  ;;  %s3649_s2 = int_to_ptr.vmem [resolvable:$true] %s3648_s2 }
 0xf9b   : > { %s4990_s9 = scalar_lea.vmem %s3649_s2, 128 }
 0xf9c   : > { %p4991_p5 = scmp.ne.s32.totalorder %s3649_s2, %s4990_s9 }
 0xf9e   : > { %p4992_p10 = pnand %p4991_p5, %p6262_p3 }
 0xfa0   : > { %v4051_v34 = vld [vmem:[%s6256_s6] ss:$0 sm:$0xff]  ;;  %p4993_p6 = pneg %p4992_p10 }
0x1005   : > { %v3181_v46 = vpop.xlane.xlu0 %3180 }
0x1006   : > { %v3182_v47 = vsub.f32 %v3175_v43, %v3181_v46  ;;  %v4055_v46 = vld [vmem:[%s6259_s12] ss:$0 sm:$0xff] }
0x1008   : > { %v3183_v48 = vmul.f32 1.442695, %v3182_v47 }
0x1009   : > { %v3196_v51 = vpop.permute.xlu0 %3195 }
0x100a   : > { %4720 = vpow2.f32 %v3183_v48  ;;  %4396 = vmatpush3.msra.mxu1 %v3196_v51 }
0x100b   : > { %4397 = vmatprep.subr.mxu1 %v5231_v0 }
0x100d   : > { %v3192_v55 = vpop.permute.xlu0 %3191 }
0x1011   : > { %v3279_v4 = vpop.permute.xlu0 %3278 }
0x1017   : > { %v4721_v53 = vpop.eup %4720 }
0x1018   : > { %v3185_v54 = vsel %vm2170_vm4, %v4721_v53, 0.0 }
0x1019   : > { %3186 = vadd.xlane.f32.xlu1 %v3185_v54 }
0x102a   : > { %3193 = vrot.lane.b32.xlu1 %v5917_v49, %s5235_s29  ;;  %s6254_s29 = smov 24  }
0x102e   : > { %3274 = vrot.lane.b32.xlu1 %v5972_v22, %s5236_s13  ;;  %s6255_s13 = sld [smem:[#allocation51_spill]] }
0x1034   : > { %v3490_v26 = vld [vmem:[%s6255_s13 + $0x38] sm:$0xff]  ;;  %v3489_v27 = vld [vmem:[%s6255_s13 + $0x30] sm:$0xff]  ;;  %v3488_v30 = vld [vmem:[%s6255_s13 + $0x28] sm:$0xff] }
0x1035   : > { %v3487_v31 = vld [vmem:[%s6255_s13 + $0x20] sm:$0xff]  ;;  %v3486_v29 = vld [vmem:[%s6255_s13 + $0x18] sm:$0xff]  ;;  %v3485_v16 = vld [vmem:[%s6255_s13 + $0x10] sm:$0xff] }
0x1036   : > { %v3484_v18 = vld [vmem:[%s6255_s13 + $0x8] sm:$0xff]  ;;  %v3483_v40 = vld [vmem:[%s6255_s13] sm:$0xff]  ;;  %s5239_s13 = smov [#allocation20]  }
0x1037   : > { %s4994_s24 = sshll.u32 %s5239_s13, 4  ;;  %s4995_s24 = int_to_ptr.vmem [resolvable:$false] %s4994_s24 }
0x1038   : > { %s4996_s16 = scalar_lea.vmem %s4995_s24, 256  ;;  %p4997_p8 = scmp.lt.s32.totalorder %s3649_s2, %s4995_s24 }
0x1039   : > { %p4998_p9 = scmp.lt.s32.totalorder %s4996_s16, %s4990_s9 }
0x103b   : > { %p4999_p11 = por %p4998_p9, %p4997_p8 }
0x103d   : > { %p5000_p13 = pnand %p4999_p11, %p4993_p6 }
0x10a2   : > { %v3187_v50 = vpop.xlane.xlu1 %3186 }
0x10a3   : > { %4722 = vrcp.f32 %v3187_v50 }
0x10a6   : > { %v3194_v52 = vpop.permute.xlu1 %3193 }
0x10a7   : > { %4398 = vmatpush3.msra.mxu1 %v3194_v52 }
0x10a8   : > { %4399 = vmatprep.subr.mxu1 %v5231_v0 }
0x10a9   : > { %4400 = vmatpush3.msra.mxu1 %v3192_v55 }
0x10aa   : > { %4404 = vmatprep.subr.mxu1 %v5231_v0  ;;  %v3275_v2 = vpop.permute.xlu1 %3274 }
0x10ab   : > { %v3285_v3 = vsel %vm1469_vm2, %v5970_v20, %v3275_v2 }
0x10ac   : > { %v3286_v6 = vsel %vm1549_vm3, %v3285_v3, %v3279_v4 }
0x10b0   : > { %v4723_v56 = vpop.eup %4722 }
0x10b1   : > { %v3189_v57 = vmul.f32 %v4723_v56, %v4721_v53 }
0x10b3   : > { %4402 = vmatmul.mubr.msk.f32.vlgmr.msra.gmra.mxu1 %vm2170_vm4, %v3189_v57  ;;  %v3190_v49 = vadd.f32 %v3189_v57, %v3010_v39 }
0x10b4   : > { %4412 = vmatprep.mubr.msk.f32.mxu1 %vm5232_vm0, %v5231_v0  ;;  %4405 = vmatpush3.msra.mxu1 %v2301_v60 }
0x10b5   : > { %v3367_v58 = vmul.f32 0.25, %v3190_v49  ;;  %4406 = vmatprep.subr.mxu1 %v5231_v0 }
0x10b6   : > { %4407 = vmatpush3.msra.mxu1 %v2300_v11 }
0x10b7   : > { %v3605_v59 = vsel %vm2170_vm4, %v3367_v58, 0.0  ;;  %4408 = vmatprep.subr.mxu1 %v5231_v0 }
0x10b8   : > { %3606 = vst [vmem:[%s6173_s4] sm:$0xff] %v3605_v59  ;;  %4409 = vmatpush3.msra.mxu1 %v2299_v61  ;;  %s6078_s4 = scalar_lea.sflag [#allocation21], %s3612_s17 }
0x10b9   : > { %4410 = vmatprep.subr.mxu1 %v5231_v0 }
0x10ba   : > { %4411 = vmatpush3.msra.mxu1 %v2298_v62 }
0x10bb   : > { %4426 = vmatprep.subr.mxu1 %v5231_v0 }
0x1173   : > { %v3269_v63 = vpop.f32.mrf.mxu1 }
0x1174   : > { %3282 = vrot.lane.b32.xlu1 %v3269_v63, %s6254_s29  ;;  %s3629_s29 = sadd.s32 %s6241_s18, %s4062_s28 }
0x1175   : > { %v4403_v1 = vpop.f32.mrf.mxu1  ;;  %s6072_s6 = sshll.u32 %s3629_s29, 7 }
0x1176   : > { %s3646_s12 = scalar_lea.hbm %s6260_s27, %s6072_s6 }
0x11e6   : > { %v3283_v5 = vpop.permute.xlu1 %3282 }
0x11e7   : > { %v3287_v7 = vsel %vm2170_vm4, %v3286_v6, %v3283_v5 }
0x11e8   : > { %4413 = vmatmul.mubr.msk.f32.vlgmr.msra.gmra.mxu1 %vm1227_vm1, %v3287_v7 }
0x11e9   : > { %4442 = vmatprep.mubr.msk.f32.mxu1 %vm5232_vm0, %v5231_v0  ;;  %4427 = vmatpush3.msra.mxu1 %v3490_v26 }
0x11ea   : > { %4428 = vmatprep.subr.mxu1 %v5231_v0 }
0x11eb   : > { %4429 = vmatpush3.msra.mxu1 %v3489_v27 }
0x11ec   : > { %4430 = vmatprep.subr.mxu1 %v5231_v0 }
0x11ed   : > { %4431 = vmatpush3.msra.mxu1 %v3488_v30 }
0x11ee   : > { %4432 = vmatprep.subr.mxu1 %v5231_v0 }
0x11ef   : > { %4433 = vmatpush3.msra.mxu1 %v3487_v31 }
0x11f0   : > { %4434 = vmatprep.subr.mxu1 %v5231_v0 }
0x11f1   : > { %4435 = vmatpush3.msra.mxu1 %v3486_v29 }
0x11f2   : > { %4436 = vmatprep.subr.mxu1 %v5231_v0 }
0x11f3   : > { %4437 = vmatpush3.msra.mxu1 %v3485_v16 }
0x11f4   : > { %4438 = vmatprep.subr.mxu1 %v5231_v0 }
0x11f5   : > { %4439 = vmatpush3.msra.mxu1 %v3484_v18 }
0x11f6   : > { %4440 = vmatprep.subr.mxu1 %v5231_v0 }
0x11f7   : > { %4441 = vmatpush3.msra.mxu1 %v3483_v40 }
0x12a8   : > { %v3363_v9 = vpop.f32.mrf.mxu1 }
0x12a9   : > { %v3364_v10 = vadd.f32 %v4049_v8, %v3363_v9 }
0x12aa   : > { %v4414_v12 = vpop.f32.mrf.mxu1 }
0x12ab   : > { %v3368_v14 = vadd.f32 %v3364_v10, %v5875_v28  ;;  %v3399_v28 = vld [vmem:[#allocation17 + $0x8] sm:$0xff] }
0x12ac   : > { %4420 = vmatpush3.msra.mxu0 %v3399_v28 }
0x12ad   : > { %v3371_v15 = vsel %vm1227_vm1, %v3368_v14, 0.0  ;;  %4421 = vmatprep.subr.mxu0 %v5231_v0 }
0x12ae   : > { %3372 = vadd.xlane.f32.xlu0 %v3371_v15  ;;  %4422 = vmatpush3.msra.mxu0 %v3398_v25 }
0x1337   : > { %v3373_v17 = vpop.xlane.xlu0 %3372 }
0x1338   : > { %v3374_v19 = vmul.f32 0.03125, %v3373_v17 }
0x133a   : > { %v3375_v20 = vsub.f32 %v3368_v14, %v3374_v19 }
0x133c   : > { %v3376_v21 = vmul.f32 %v3375_v20, %v3375_v20 }
0x133e   : > { %v3377_v22 = vsel %vm1227_vm1, %v3376_v21, 0.0 }
0x133f   : > { %3378 = vadd.xlane.f32.xlu1 %v3377_v22 }
0x13c8   : > { %v3379_v32 = vpop.xlane.xlu1 %3378 }
0x13c9   : > { %v3380_v33 = vmul.f32 0.03125, %v3379_v32 }
0x13cb   : > { %v3381_v35 = vadd.f32 1e-06, %v3380_v33 }
0x13cd   : > { %4724 = vrsqrt.f32 %v3381_v35 }
0x13da   : > { %v4725_v13 = vpop.eup %4724 }
0x13db   : > { %v3383_v36 = vmul.f32 %v4725_v13, %v3375_v20 }
0x13dd   : > { %v3390_v38 = vmul.f32 %v4051_v34, %v3383_v36 }
0x13df   : > { %v3397_v39 = vadd.f32 %v4052_v37, %v3390_v38 }
0x13e1   : > { %4424 = vmatmul.mubr.msk.f32.vlgmr.msra.gmra.mxu0 %vm1227_vm1, %v3397_v39 }
0x14a1   : > { %v3478_v42 = vpop.f32.mrf.mxu0 }
0x14a2   : > { %v3479_v43 = vadd.f32 %v4053_v41, %v3478_v42 }
0x14a3   : > { %v4425_v44 = vpop.f32.mrf.mxu0 }
0x14a4   : > { %v3482_v45 = vmax.f32 %v3479_v43, 0.0 }
0x14a6   : > { %4443 = vmatmul.mubr.msk.f32.vlgmr.msra.gmra.mxu1 %vm3498_vm5, %v3482_v45 }
0x1566   : > { %v3568_v47 = vpop.f32.mrf.mxu1 }
0x1567   : > { %v3569_v48 = vadd.f32 %v4055_v46, %v3568_v47 }
0x1568   : > { %v4444_v51 = vpop.f32.mrf.mxu1 }
0x1569   : > { %v3572_v53 = vadd.f32 %v3569_v48, %v3397_v39 }
0x156b   : > { %v3575_v0 = vsel %vm1227_vm1, %v3572_v53, 0.0 }
0x156c   : > { %3576 = vadd.xlane.f32.xlu0 %v3575_v0 }
0x15f5   : > { %v3577_v54 = vpop.xlane.xlu0 %3576 }
0x15f6   : > { %v3578_v50 = vmul.f32 0.03125, %v3577_v54 }
0x15f8   : > { %v6064_v52 = vsub.f32 %v3572_v53, %v3578_v50 }
0x15fa   : > { %v3580_v55 = vmul.f32 %v6064_v52, %v6064_v52 }
0x15fc   : > { %v3581_v56 = vsel %vm1227_vm1, %v3580_v55, 0.0 }
0x15fd   : > { %3582 = vadd.xlane.f32.xlu0 %v3581_v56 }
0x15fe   : > { %5003 = shalt.err (!%p5000_p13)
}
0x15ff   : > { %s5004_s7 = scalar_lea.hbm %s3646_s12, 128  ;;  %s5008_s18 = scalar_lea.hbm %s6260_s27, 512 }
0x1600   : > { %p5005_p2 = scmp.ne.s32.totalorder %s3646_s12, %s5004_s7  ;;  %p5009_p7 = scmp.lt.s32.totalorder %s3646_s12, %s6260_s27 }
0x1601   : > { %p5010_p1 = scmp.lt.s32.totalorder %s5008_s18, %s5004_s7 }
0x1602   : > { %p5006_p4 = pnand %p5005_p2, %p6262_p3 }
0x1603   : > { %p5011_p12 = por %p5010_p1, %p5009_p7 }
0x1604   : > { %p5007_p0 = pneg %p5006_p4 }
0x1606   : > { %p5012_p5 = pnand %p5011_p12, %p5007_p0 }
0x1608   : > { %5015 = shalt.err (!%p5012_p5)
}
0x1609   : > { %s6263_s9 = sld [smem:[#allocation61_spill]]  ;;  %s6264_s24 = scalar_lea.vmem [#allocation22], %s5795_s20 }
0x160a   : > { %4485 = dma.vmem_to_hbm [thread:$0]  (%p6262_p3), %s3649_s2, 128, %s3646_s12, %s6078_s4  }
0x160b   : > { %s3663_s13 = sshll.u32 %s6264_s24, 4  ;;  %s5240_s29 = smov [#allocation22]   ;;  %s3664_s13 = int_to_ptr.vmem [resolvable:$true] %s3663_s13 }
0x160c   : > { %s5016_s28 = scalar_lea.vmem %s3664_s13, 128  ;;  %s5020_s8 = sshll.u32 %s5240_s29, 4  ;;  %s5021_s8 = int_to_ptr.vmem [resolvable:$false] %s5020_s8 }
0x160d   : > { %p5017_p10 = scmp.ne.s32.totalorder %s3664_s13, %s5016_s28  ;;  %s5022_s16 = scalar_lea.vmem %s5021_s8, 256 }
0x160e   : > { %p5023_p9 = scmp.lt.s32.totalorder %s3664_s13, %s5021_s8  ;;  %p5024_p11 = scmp.lt.s32.totalorder %s5022_s16, %s5016_s28 }
0x160f   : > { %s3661_s17 = scalar_lea.hbm %s6263_s9, %s6072_s6  ;;  %p5018_p6 = pnand %p5017_p10, %p6262_p3 }
0x1610   : > { %p5025_p13 = por %p5024_p11, %p5023_p9 }
0x1611   : > { %p5019_p8 = pneg %p5018_p6 }
0x1613   : > { %p5026_p2 = pnand %p5025_p13, %p5019_p8 }
0x1615   : > { %5029 = shalt.err (!%p5026_p2)
}
0x1616   : > { %s5030_s7 = scalar_lea.hbm %s3661_s17, 128  ;;  %s5034_s2 = scalar_lea.hbm %s6263_s9, 512 }
0x1617   : > { %p5031_p4 = scmp.ne.s32.totalorder %s3661_s17, %s5030_s7  ;;  %p5035_p1 = scmp.lt.s32.totalorder %s3661_s17, %s6263_s9 }
0x1618   : > { %p5036_p12 = scmp.lt.s32.totalorder %s5034_s2, %s5030_s7 }
0x1619   : > { %p5032_p0 = pnand %p5031_p4, %p6262_p3 }
0x161a   : > { %p5037_p5 = por %p5036_p12, %p5035_p1 }
0x161b   : > { %p5033_p7 = pneg %p5032_p0 }
0x161d   : > { %p5038_p10 = pnand %p5037_p5, %p5033_p7 }
0x161f   : > { %5041 = shalt.err (!%p5038_p10)
}
0x1620   : > { %s6265_s12 = sld [smem:[#allocation57_spill]]  ;;  %s1167_s28 = scalar_lea.vmem [#allocation19], %s5795_s20 }
0x1621   : > { %s6266_s18 = sld [smem:[#allocation58_spill]]  ;;  %s3633_s29 = sshll.u32 %s1167_s28, 4  ;;  %s3634_s29 = int_to_ptr.vmem [resolvable:$true] %s3633_s29 }
0x1622   : > { %s6267_s24 = sld [smem:[#allocation59_spill]]  ;;  %s5241_s16 = smov [#allocation19]  }
0x1623   : > { %4486 = dma.vmem_to_hbm [thread:$0]  (%p6262_p3), %s3664_s13, 128, %s3661_s17, %s6078_s4  }
0x1624   : > { %s6268_s4 = sand.u32 1, %s5150_s23   ;;  %s5042_s17 = scalar_lea.vmem %s3634_s29, 128 }
0x1625   : > { %s3608_s13 = scalar_lea.sflag [#allocation4], %s6268_s4  ;;  %p5043_p6 = scmp.ne.s32.totalorder %s3634_s29, %s5042_s17 }
0x1626   : > { %v4057_v60 = vld [vmem:[%s6265_s12] ss:$0 sm:$0xff]  ;;  %s5046_s7 = sshll.u32 %s5241_s16, 4  ;;  %s5047_s7 = int_to_ptr.vmem [resolvable:$false] %s5046_s7 }
0x1627   : > { %v4058_v61 = vld [vmem:[%s6266_s18] ss:$0 sm:$0xff]  ;;  %p5044_p8 = pnand %p5043_p6, %p6262_p3  ;;  %s5048_s2 = scalar_lea.vmem %s5047_s7, 256 }
0x1628   : > { %s3631_s8 = scalar_lea.hbm %s6267_s24, %s6072_s6  ;;  %p5049_p11 = scmp.lt.s32.totalorder %s3634_s29, %s5047_s7 }
0x1629   : > { %p5045_p9 = pneg %p5044_p8  ;;  %p5050_p13 = scmp.lt.s32.totalorder %s5048_s2, %s5042_s17 }
0x162b   : > { %p5051_p2 = por %p5050_p13, %p5049_p11 }
0x162d   : > { %p5052_p4 = pnand %p5051_p2, %p5045_p9 }
0x1686   : > { %v3583_v57 = vpop.xlane.xlu0 %3582 }
0x1687   : > { %v3584_v49 = vmul.f32 0.03125, %v3583_v57 }
0x1689   : > { %v3585_v58 = vadd.f32 1e-06, %v3584_v49 }
0x168b   : > { %4726 = vrsqrt.f32 %v3585_v58 }
0x1698   : > { %v4727_v59 = vpop.eup %4726 }
0x1699   : > { %v3587_v11 = vmul.f32 %v4727_v59, %v6064_v52 }
0x169b   : > { %v3594_v62 = vmul.f32 %v4057_v60, %v3587_v11 }
0x169d   : > { %v3601_v63 = vadd.f32 %v4058_v61, %v3594_v62 }
0x169f   : > { %3602 = vst.msk [vmem:[%s1167_s28] sm:$0xff] %vm1227_vm1, %v3601_v63 }
0x16a0   : > { %5055 = shalt.err (!%p5052_p4)
}
0x16a1   : > { %s5056_s20 = scalar_lea.hbm %s3631_s8, 128  ;;  %s5060_s6 = scalar_lea.hbm %s6267_s24, 512 }
0x16a2   : > { %p5057_p0 = scmp.ne.s32.totalorder %s3631_s8, %s5056_s20  ;;  %p5061_p12 = scmp.lt.s32.totalorder %s3631_s8, %s6267_s24 }
0x16a3   : > { %p5062_p5 = scmp.lt.s32.totalorder %s5060_s6, %s5056_s20 }
0x16a4   : > { %p5058_p7 = pnand %p5057_p0, %p6262_p3 }
0x16a5   : > { %p5063_p10 = por %p5062_p5, %p5061_p12 }
0x16a6   : > { %p5059_p1 = pneg %p5058_p7 }
0x16a8   : > { %p5064_p6 = pnand %p5063_p10, %p5059_p1 }
0x16aa   : > { %5067 = shalt.err (!%p5064_p6)
}
0x16ab   : > { %4484 = dma.vmem_to_hbm [thread:$0]  (%p6262_p3), %s3634_s29, 128, %s3631_s8, %s3608_s13  }
0x16ac PF: > { %p4551_p8 = scmp.ge.s32.totalorder %s5186_s15, 2  ;;  %s3675_s12 = sand.u32 1, %s5146_s22  }
0x16ad   : > { %p6269_p9 = scmp.ne.s32.totalorder %s6225_s14, 0  ;;  %s3676_s18 = scalar_lea.sflag [#allocation4], %s3675_s12 }
0x16af   : > { %p4523_p11 = pnand %p4551_p8, %p6269_p9 }
0x16b1   : > { %p4524_p13 = pneg %p4523_p11 }
0x16b3   : > { %5137 = dma.done.wait (%p4524_p13), %s3676_s18, 128  }
0x16b4   : > { %5139 = vsyncadd (%p4524_p13), %s3676_s18, 4294967168  ;;  %s6270_s28 = sadd.s32 4294967294, %s5186_s15  }
0x16b5   : > { %s3684_s4 = sand.u32 1, %s6270_s28  }
0x16b6   : > { %s3685_s17 = scalar_lea.sflag [#allocation21], %s3684_s4 }
0x16b7   : > { %5141 = dma.done.wait (%p4524_p13), %s3685_s17, 256  }
0x16b8   : > { %5143 = vsyncadd (%p4524_p13), %s3685_s17, 4294967040  ;;  %s88_s15 = sadd.s32 1, %s5186_s15   ;;  %s6271_s22 = smov %s5150_s23 }
0x16b9   : > { %p85_p3 = scmp.ge.s32.totalorder %s88_s15, 6   ;;  %s6272_s23 = smov %s5154_s26 }
0x16ba   : > { %s6273_s26 = smov %s5600_s5  ;;  %s6274_s28 = smov %s5162_s0 }
0x16bb   : > { %s6275_s0 = smov %s5166_s1  ;;  %s6276_s1 = smov %s5597_s21 }
0x16bc   : > { %s6277_s2 = smov %s5178_s10  ;;  %s6278_s7 = smov %s5182_s11 }
0x16bd   : > { %s6279_s10 = smov %s6282_s19  ;;  %s6280_s11 = smov %s6286_s3 }
0x16be   :  { %87 = sbr.rel (!%p85_p3) target bundleno = 84 (0x54), region = 286 }
0x16c3   :  { %3699 = vsyncpa [#allocation3], 1 }
0x16c4   :  { %3701 = vsyncpa [#allocation3 + $0x1], 1 }
0x16c5   :  { %3702 = vsyncpa [#allocation6], 1 }
0x16c6   :  { %3703 = vsyncpa [#allocation9], 1 }
0x16c7   :  { %3704 = vsyncpa [#allocation12], 1 }
0x16c8   :  { %3705 = vsyncpa [#allocation15], 1 }
0x16c9   :  { %3706 = vsyncpa [#allocation18], 1 }
0x16ca   :  { %3707 = vsyncpa [#allocation4], 1 }
0x16cb   :  { %3709 = vsyncpa [#allocation4 + $0x1], 1 }
0x16cc   :  { %3710 = vsyncpa [#allocation21], 1 }
0x16cd   :  { %3712 = vsyncpa [#allocation21 + $0x1], 1 }

</bundles_post_ra>
